<compile_context>
chip_gen: v5e
topology: v5e:2x2
jax: 0.10.0
libtpu: 0.0.40
codegen_flags: <defaults>
</compile_context>

<pallas_src>
import functools
import math

import jax
import jax.numpy as jnp
from jax.experimental import pallas as pl
from jax.experimental.pallas import tpu as pltpu


_NEG_INF = -1e30  # large finite negative (avoids inf-inf NaN risks)


def _pick_tile(n, candidates):
    for t in candidates:
        if t <= n and n % t == 0:
            return t
    return n


def _pick_attn_tile(seq_len, w):
    cands = (256, 128, 64, 32, 16, 8)
    # Prefer tiles that also divide the band half-width: interior kv tiles are
    # then fully in-band and need no mask work at all.
    for t in cands:
        if seq_len % t == 0 and w % t == 0:
            return t
    for t in cands:
        if seq_len % t == 0:
            return t
    return seq_len


def _vmem_limit_bytes():
    # 96 MiB on 128 MiB parts (v5e/v6e), ~48 MiB on the 64 MiB v7x.
    try:
        cap = pltpu.get_tpu_info().vmem_capacity_bytes
    except Exception:
        cap = 64 * 1024 * 1024
    return int(min(96 * 1024 * 1024, (cap * 3) // 4))


# ---------------------------------------------------------------------------
# Kernel 1: fused Q/K/V projection -> head-major (B, H, S, D) outputs.
# One matmul per token tile against the concatenated (E, 3E) weight (the
# 1/sqrt(head_dim) scale is pre-folded into the q columns).  The per-head
# split happens here, once per token, instead of on every attention kv step.
# ---------------------------------------------------------------------------
def _qkv_proj_kernel(x_ref, w_ref, b_ref, q_ref, k_ref, v_ref, *, H, D, E):
    x = x_ref[0]                                           # (tile_s, E), already MXU dtype
    y = jnp.dot(x, w_ref[...], preferred_element_type=jnp.float32) + b_ref[...]
    for h in range(H):
        q_ref[0, h] = y[:, h * D:(h + 1) * D].astype(q_ref.dtype)
        k_ref[0, h] = y[:, E + h * D:E + (h + 1) * D].astype(k_ref.dtype)
        v_ref[0, h] = y[:, 2 * E + h * D:2 * E + (h + 1) * D].astype(v_ref.dtype)


def qkv_projection(x, WqkvT, bqkv, H, D, out_dtype, vmem_limit):
    """x: (B, S, E) in MXU dtype.  Returns q, k, v each (B, H, S, D)."""
    B, S, E = x.shape
    tile_s = _pick_tile(S, (1024, 512, 256, 128, 64, 32, 16, 8))
    out_sds = jax.ShapeDtypeStruct((B, H, S, D), out_dtype)
    kernel = functools.partial(_qkv_proj_kernel, H=H, D=D, E=E)

    def call(single_buffer_weights):
        resident = (dict(pipeline_mode=pl.Buffered(1))
                    if single_buffer_weights else {})
        out_spec = pl.BlockSpec((1, H, tile_s, D), lambda si, b: (b, 0, si, 0))
        return pl.pallas_call(
            kernel,
            grid=(S // tile_s, B),
            in_specs=(
                pl.BlockSpec((1, tile_s, E), lambda si, b: (b, si, 0)),     # x tile
                pl.BlockSpec((E, 3 * E), lambda si, b: (0, 0), **resident),  # fused W
                pl.BlockSpec((1, 3 * E), lambda si, b: (0, 0), **resident),  # fused bias
            ),
            out_specs=(out_spec, out_spec, out_spec),
            out_shape=(out_sds, out_sds, out_sds),
            compiler_params=pltpu.CompilerParams(
                dimension_semantics=("parallel", "parallel"),
                vmem_limit_bytes=vmem_limit,
            ),
        )(x, WqkvT, bqkv)

    try:
        return call(True)
    except Exception:
        # Fall back to default double-buffering if Buffered(1) is unsupported.
        return call(False)


# ---------------------------------------------------------------------------
# Kernel 2: banded (sliding-window) flash-style attention.
# Grid = (S//T, B, kv_steps); q/k/v blocks are (1, H, T, D) head-major, so all
# head indexing is along a major axis (no lane relayouts).  Online softmax
# statistics (m, l) and the fp32 accumulator live in VMEM scratch.  Output is
# written lane-dense in (B, S, E) layout at the last kv step.
# ---------------------------------------------------------------------------
def _banded_attn_kernel(q_ref, k_ref, v_ref, o_ref, m_ref, l_ref, acc_ref,
                        *, H, D, T, w, n_side, exp_dtype, approx_recip):
    qi = pl.program_id(0)
    s = pl.program_id(2)
    n_q = pl.num_programs(0)
    kv_tile = qi + s - n_side            # intended kv tile (may be out of range)

    @pl.when(s == 0)
    def _init():
        m_ref[...] = jnp.full_like(m_ref, _NEG_INF)
        l_ref[...] = jnp.zeros_like(l_ref)
        acc_ref[...] = jnp.zeros_like(acc_ref)

    valid = jnp.logical_and(kv_tile >= 0, kv_tile < n_q)
    # Interior kv tiles are fully in-band: max |row-col| inside the (T,T) block
    # is (|s - n_side| + 1) * T - 1.  Only band-edge tiles need masking.
    needs_mask = (jnp.abs(s - n_side) + 1) * T - 1 > w

    def _step(apply_mask):
        if apply_mask:
            # Shared additive band bias: row - col = (n_side - s)*T + (i - j).
            rel = (jax.lax.broadcasted_iota(jnp.int32, (T, T), 0)
                   - jax.lax.broadcasted_iota(jnp.int32, (T, T), 1)
                   + (n_side - s) * T)
            bias = jnp.where(jnp.abs(rel) <= w, 0.0, _NEG_INF).astype(jnp.float32)
        for h in range(H):
            qh = q_ref[0, h]                              # (T, D) -- major-axis index
            kh = k_ref[0, h]
            vh = v_ref[0, h]
            # q @ k^T via transposed contraction (no XLU transpose)
            s_h = jax.lax.dot_general(
                qh, kh, (((1,), (1,)), ((), ())),
                preferred_element_type=jnp.float32)       # (T, T) fp32
            if apply_mask:
                s_h = s_h + bias
            m_prev = m_ref[h]                             # (T, 1)
            m_new = jnp.maximum(m_prev, jnp.max(s_h, axis=-1, keepdims=True))
            alpha = jnp.exp(m_prev - m_new)
            p = jnp.exp((s_h - m_new).astype(exp_dtype))  # bf16 exp on the fast path
            l_ref[h] = alpha * l_ref[h] + jnp.sum(
                p.astype(jnp.float32), axis=-1, keepdims=True)
            acc_ref[h] = alpha * acc_ref[h] + jax.lax.dot_general(
                p.astype(vh.dtype), vh, (((1,), (0,)), ((), ())),
                preferred_element_type=jnp.float32)       # (T, D) fp32
            m_ref[h] = m_new

    @pl.when(jnp.logical_and(valid, needs_mask))
    def _masked_step():
        _step(True)

    @pl.when(jnp.logical_and(valid, jnp.logical_not(needs_mask)))
    def _unmasked_step():
        _step(False)

    @pl.when(s == pl.num_programs(2) - 1)
    def _finalize():
        # Write per lane-aligned head group (multiples of 128 lanes when possible).
        if D % 128 == 0:
            group = 1
        elif (128 % D == 0) and (H % (128 // D) == 0):
            group = 128 // D
        else:
            group = H
        for g0 in range(0, H, group):
            parts = []
            for h in range(g0, g0 + group):
                inv_l = pl.reciprocal(l_ref[h], approx=approx_recip)
                parts.append(acc_ref[h] * inv_l)
            blk = parts[0] if len(parts) == 1 else jnp.concatenate(parts, axis=-1)
            o_ref[0, :, g0 * D:(g0 + group) * D] = blk.astype(o_ref.dtype)


def sliding_window_attention(q, k, v, w, out_dtype, vmem_limit):
    """q, k, v: (B, H, S, D) head-major -> context (B, S, E)."""
    B, H, S, D = q.shape
    E = H * D
    T = _pick_attn_tile(S, w)
    n_q = S // T
    n_side = min(pl.cdiv(w, T), n_q - 1)
    n_kv = 2 * n_side + 1

    approx_recip = q.dtype != jnp.float32
    exp_dtype = jnp.bfloat16 if q.dtype == jnp.bfloat16 else jnp.float32

    def q_map(qi, b, s):
        return (b, 0, qi, 0)

    def kv_map(qi, b, s):
        t = jnp.clip(qi + s - n_side, 0, n_q - 1)         # clamp; kernel skips invalid
        return (b, 0, t, 0)

    def o_map(qi, b, s):
        return (b, qi, 0)

    kernel = functools.partial(
        _banded_attn_kernel, H=H, D=D, T=T, w=w, n_side=n_side,
        exp_dtype=exp_dtype, approx_recip=approx_recip)

    return pl.pallas_call(
        kernel,
        grid=(n_q, B, n_kv),
        in_specs=(
            pl.BlockSpec((1, H, T, D), q_map),
            pl.BlockSpec((1, H, T, D), kv_map),
            pl.BlockSpec((1, H, T, D), kv_map),
        ),
        out_specs=pl.BlockSpec((1, T, E), o_map),
        out_shape=jax.ShapeDtypeStruct((B, S, E), out_dtype),
        scratch_shapes=[
            pltpu.VMEM((H, T, 1), jnp.float32),           # running max
            pltpu.VMEM((H, T, 1), jnp.float32),           # running sum
            pltpu.VMEM((H, T, D), jnp.float32),           # fp32 accumulator
        ],
        compiler_params=pltpu.CompilerParams(
            dimension_semantics=("parallel", "parallel", "arbitrary"),
            vmem_limit_bytes=vmem_limit,
        ),
    )(q, k, v)


# ---------------------------------------------------------------------------
# Module-level wrapper reproducing LongformerSelfAttention.forward
# (attention_mask=None path).  hidden_states is used in (B, S, E) layout end
# to end; the PyTorch (S, B, E) transpose is irrelevant to the result since
# the linear layers are position-wise.
# ---------------------------------------------------------------------------
def longformer_self_attention(hidden_states, params, num_heads, one_sided_window,
                              *, mxu_dtype=jnp.bfloat16):
    B, S, E = hidden_states.shape
    H = num_heads
    D = E // H
    w = int(one_sided_window)
    assert E % H == 0
    assert S % (2 * w) == 0, "sequence length must be a multiple of attention_window"

    out_dtype = hidden_states.dtype
    vmem_limit = _vmem_limit_bytes()
    scale = 1.0 / math.sqrt(D)

    # Fused qkv weight (x @ W^T form) and bias; 1/sqrt(D) folded into q columns.
    WqkvT = jnp.concatenate(
        [params["Wq"].T * scale, params["Wk"].T, params["Wv"].T],
        axis=1).astype(mxu_dtype)
    bqkv = jnp.concatenate(
        [params["bq"] * scale, params["bk"], params["bv"]])[None, :].astype(jnp.float32)

    x = hidden_states.astype(mxu_dtype)                   # single cast in the wrapper

    q, k, v = qkv_projection(x, WqkvT, bqkv, H, D, mxu_dtype, vmem_limit)
    return sliding_window_attention(q, k, v, w, out_dtype, vmem_limit)  # == context_layer


# ---------------------------------------------------------------------------
# Pure-JAX fp32 reference (same math, no Pallas) for a correctness check.
# ---------------------------------------------------------------------------
def reference(hidden_states, params, num_heads, w):
    B, S, E = hidden_states.shape
    H = num_heads
    D = E // H
    q = hidden_states @ params["Wq"].T + params["bq"]
    k = hidden_states @ params["Wk"].T + params["bk"]
    v = hidden_states @ params["Wv"].T + params["bv"]
    q = q / math.sqrt(D)

    def split(t):
        return t.reshape(B, S, H, D).transpose(0, 2, 1, 3)   # (B, H, S, D)

    q, k, v = split(q), split(k), split(v)
    scores = jnp.einsum("bhsd,bhtd->bhst", q, k)
    i_idx = jnp.arange(S)[:, None]
    j_idx = jnp.arange(S)[None, :]
    band = jnp.abs(i_idx - j_idx) <= w
    scores = jnp.where(band, scores, -jnp.inf)
    probs = jax.nn.softmax(scores, axis=-1)
    out = jnp.einsum("bhst,bhtd->bhsd", probs, v)
    return out.transpose(0, 2, 1, 3).reshape(B, S, E)


if __name__ == "__main__":
    # config: hidden_size=64, num_attention_heads=4, attention_window=8
    B, S, E, H = 2, 16, 64, 4
    D = E // H
    attention_window = 8
    w = attention_window // 2

    key = jax.random.PRNGKey(0)
    keys = jax.random.split(key, 7)
    hidden_states = jax.random.normal(keys[0], (B, S, E), dtype=jnp.float32)

    params = {
        "Wq": 0.05 * jax.random.normal(keys[1], (E, E), dtype=jnp.float32),
        "Wk": 0.05 * jax.random.normal(keys[2], (E, E), dtype=jnp.float32),
        "Wv": 0.05 * jax.random.normal(keys[3], (E, E), dtype=jnp.float32),
        "bq": 0.01 * jax.random.normal(keys[4], (E,), dtype=jnp.float32),
        "bk": 0.01 * jax.random.normal(keys[5], (E,), dtype=jnp.float32),
        "bv": 0.01 * jax.random.normal(keys[6], (E,), dtype=jnp.float32),
    }

    ref = reference(hidden_states, params, H, w)

    # fp32 MXU-operand run (f32 exp, exact reciprocal): tight-ish check.
    ctx_f32 = longformer_self_attention(hidden_states, params, H, w,
                                        mxu_dtype=jnp.float32)
    ctx_f32 = jax.block_until_ready(ctx_f32)
    assert ctx_f32.shape == (B, S, E), ctx_f32.shape
    err_f32 = float(jnp.max(jnp.abs(ctx_f32 - ref)))
    assert err_f32 < 2e-2, f"fp32 path max abs err {err_f32}"

    # Default bf16-MXU run (bf16 exp, fp32 stats/accumulation): loose check.
    ctx_bf16 = longformer_self_attention(hidden_states, params, H, w)
    ctx_bf16 = jax.block_until_ready(ctx_bf16)
    assert ctx_bf16.shape == (B, S, E), ctx_bf16.shape
    err_bf16 = float(jnp.max(jnp.abs(ctx_bf16.astype(jnp.float32) - ref)))
    assert err_bf16 < 6e-2, f"bf16 path max abs err {err_bf16}"

    print("KERNEL_OK")
</pallas_src>

<mosaic_0001>
module attributes {stable_mosaic.version = 11 : i64} {
  func.func @_qkv_proj_kernel(%arg0: i32, %arg1: i32, %arg2: memref<1x16x64xf32, #tpu.memory_space<vmem>>, %arg3: memref<64x192xf32, #tpu.memory_space<vmem>>, %arg4: memref<1x192xf32, #tpu.memory_space<vmem>>, %arg5: memref<1x4x16x16xf32, #tpu.memory_space<vmem>>, %arg6: memref<1x4x16x16xf32, #tpu.memory_space<vmem>>, %arg7: memref<1x4x16x16xf32, #tpu.memory_space<vmem>>) attributes {dimension_semantics = [#tpu.dimension_semantics<parallel>, #tpu.dimension_semantics<parallel>], iteration_bounds = array<i64: 1, 2>, scalar_prefetch = 0 : i64, scratch_operands = 0 : i64, tpu.core_type = #tpu.core_type<tc>, window_params = [{transform_indices = @transform_0, window_bounds = array<i64: 1, 16, 64>}, {pipeline_mode = #tpu.pipeline_mode<synchronous>, transform_indices = @transform_1, window_bounds = array<i64: 64, 192>}, {pipeline_mode = #tpu.pipeline_mode<synchronous>, transform_indices = @transform_2, window_bounds = array<i64: 1, 192>}, {transform_indices = @transform_3, window_bounds = array<i64: 1, 4, 16, 16>}, {transform_indices = @transform_4, window_bounds = array<i64: 1, 4, 16, 16>}, {transform_indices = @transform_5, window_bounds = array<i64: 1, 4, 16, 16>}]} {
    %c0 = arith.constant 0 : index
    %c0_0 = arith.constant 0 : index
    %c0_1 = arith.constant 0 : index
    %0 = vector.load %arg2[%c0, %c0_0, %c0_1] : memref<1x16x64xf32, #tpu.memory_space<vmem>>, vector<1x16x64xf32>
    %1 = vector.shape_cast %0 : vector<1x16x64xf32> to vector<16x64xf32>
    %c0_2 = arith.constant 0 : index
    %c0_3 = arith.constant 0 : index
    %2 = vector.load %arg3[%c0_2, %c0_3] : memref<64x192xf32, #tpu.memory_space<vmem>>, vector<64x192xf32>
    %cst = arith.constant dense<0.000000e+00> : vector<16x192xf32>
    %3 = tpu.matmul %1, %2, %cst {dimension_numbers = #tpu.dot_dimension_numbers<[1], [0], [0], [1], [0, 0, 1, 1], [], []>} : vector<16x64xf32>, vector<64x192xf32>, vector<16x192xf32> -> vector<16x192xf32>
    %c0_4 = arith.constant 0 : index
    %c0_5 = arith.constant 0 : index
    %4 = vector.load %arg4[%c0_4, %c0_5] : memref<1x192xf32, #tpu.memory_space<vmem>>, vector<1x192xf32>
    %5 = vector.broadcast %4 : vector<1x192xf32> to vector<16x192xf32>
    %6 = arith.addf %3, %5 : vector<16x192xf32>
    %7 = vector.extract_strided_slice %6 {offsets = [0, 0], sizes = [16, 16], strides = [1, 1]} : vector<16x192xf32> to vector<16x16xf32>
    %c0_6 = arith.constant 0 : index
    %c0_7 = arith.constant 0 : index
    %c0_8 = arith.constant 0 : index
    %c0_9 = arith.constant 0 : index
    %8 = vector.load %arg5[%c0_6, %c0_7, %c0_8, %c0_9] : memref<1x4x16x16xf32, #tpu.memory_space<vmem>>, vector<1x1x16x16xf32>
    %9 = vector.shape_cast %8 : vector<1x1x16x16xf32> to vector<16x16xf32>
    %10 = vector.shape_cast %7 : vector<16x16xf32> to vector<1x1x16x16xf32>
    tpu.vector_store %arg5[%c0_6, %c0_7, %c0_8, %c0_9], %10 {strides = array<i32>} : memref<1x4x16x16xf32, #tpu.memory_space<vmem>>, vector<1x1x16x16xf32>,
    %11 = vector.extract_strided_slice %6 {offsets = [0, 64], sizes = [16, 16], strides = [1, 1]} : vector<16x192xf32> to vector<16x16xf32>
    %c0_10 = arith.constant 0 : index
    %c0_11 = arith.constant 0 : index
    %c0_12 = arith.constant 0 : index
    %c0_13 = arith.constant 0 : index
    %12 = vector.load %arg6[%c0_10, %c0_11, %c0_12, %c0_13] : memref<1x4x16x16xf32, #tpu.memory_space<vmem>>, vector<1x1x16x16xf32>
    %13 = vector.shape_cast %12 : vector<1x1x16x16xf32> to vector<16x16xf32>
    %14 = vector.shape_cast %11 : vector<16x16xf32> to vector<1x1x16x16xf32>
    tpu.vector_store %arg6[%c0_10, %c0_11, %c0_12, %c0_13], %14 {strides = array<i32>} : memref<1x4x16x16xf32, #tpu.memory_space<vmem>>, vector<1x1x16x16xf32>,
    %15 = vector.extract_strided_slice %6 {offsets = [0, 128], sizes = [16, 16], strides = [1, 1]} : vector<16x192xf32> to vector<16x16xf32>
    %c0_14 = arith.constant 0 : index
    %c0_15 = arith.constant 0 : index
    %c0_16 = arith.constant 0 : index
    %c0_17 = arith.constant 0 : index
    %16 = vector.load %arg7[%c0_14, %c0_15, %c0_16, %c0_17] : memref<1x4x16x16xf32, #tpu.memory_space<vmem>>, vector<1x1x16x16xf32>
    %17 = vector.shape_cast %16 : vector<1x1x16x16xf32> to vector<16x16xf32>
    %18 = vector.shape_cast %15 : vector<16x16xf32> to vector<1x1x16x16xf32>
    tpu.vector_store %arg7[%c0_14, %c0_15, %c0_16, %c0_17], %18 {strides = array<i32>} : memref<1x4x16x16xf32, #tpu.memory_space<vmem>>, vector<1x1x16x16xf32>,
    %19 = vector.extract_strided_slice %6 {offsets = [0, 16], sizes = [16, 16], strides = [1, 1]} : vector<16x192xf32> to vector<16x16xf32>
    %c0_18 = arith.constant 0 : index
    %c1 = arith.constant 1 : index
    %c0_19 = arith.constant 0 : index
    %c0_20 = arith.constant 0 : index
    %20 = vector.load %arg5[%c0_18, %c1, %c0_19, %c0_20] : memref<1x4x16x16xf32, #tpu.memory_space<vmem>>, vector<1x1x16x16xf32>
    %21 = vector.shape_cast %20 : vector<1x1x16x16xf32> to vector<16x16xf32>
    %22 = vector.shape_cast %19 : vector<16x16xf32> to vector<1x1x16x16xf32>
    tpu.vector_store %arg5[%c0_18, %c1, %c0_19, %c0_20], %22 {strides = array<i32>} : memref<1x4x16x16xf32, #tpu.memory_space<vmem>>, vector<1x1x16x16xf32>,
    %23 = vector.extract_strided_slice %6 {offsets = [0, 80], sizes = [16, 16], strides = [1, 1]} : vector<16x192xf32> to vector<16x16xf32>
    %c0_21 = arith.constant 0 : index
    %c1_22 = arith.constant 1 : index
    %c0_23 = arith.constant 0 : index
    %c0_24 = arith.constant 0 : index
    %24 = vector.load %arg6[%c0_21, %c1_22, %c0_23, %c0_24] : memref<1x4x16x16xf32, #tpu.memory_space<vmem>>, vector<1x1x16x16xf32>
    %25 = vector.shape_cast %24 : vector<1x1x16x16xf32> to vector<16x16xf32>
    %26 = vector.shape_cast %23 : vector<16x16xf32> to vector<1x1x16x16xf32>
    tpu.vector_store %arg6[%c0_21, %c1_22, %c0_23, %c0_24], %26 {strides = array<i32>} : memref<1x4x16x16xf32, #tpu.memory_space<vmem>>, vector<1x1x16x16xf32>,
    %27 = vector.extract_strided_slice %6 {offsets = [0, 144], sizes = [16, 16], strides = [1, 1]} : vector<16x192xf32> to vector<16x16xf32>
    %c0_25 = arith.constant 0 : index
    %c1_26 = arith.constant 1 : index
    %c0_27 = arith.constant 0 : index
    %c0_28 = arith.constant 0 : index
    %28 = vector.load %arg7[%c0_25, %c1_26, %c0_27, %c0_28] : memref<1x4x16x16xf32, #tpu.memory_space<vmem>>, vector<1x1x16x16xf32>
    %29 = vector.shape_cast %28 : vector<1x1x16x16xf32> to vector<16x16xf32>
    %30 = vector.shape_cast %27 : vector<16x16xf32> to vector<1x1x16x16xf32>
    tpu.vector_store %arg7[%c0_25, %c1_26, %c0_27, %c0_28], %30 {strides = array<i32>} : memref<1x4x16x16xf32, #tpu.memory_space<vmem>>, vector<1x1x16x16xf32>,
    %31 = vector.extract_strided_slice %6 {offsets = [0, 32], sizes = [16, 16], strides = [1, 1]} : vector<16x192xf32> to vector<16x16xf32>
    %c0_29 = arith.constant 0 : index
    %c2 = arith.constant 2 : index
    %c0_30 = arith.constant 0 : index
    %c0_31 = arith.constant 0 : index
    %32 = vector.load %arg5[%c0_29, %c2, %c0_30, %c0_31] : memref<1x4x16x16xf32, #tpu.memory_space<vmem>>, vector<1x1x16x16xf32>
    %33 = vector.shape_cast %32 : vector<1x1x16x16xf32> to vector<16x16xf32>
    %34 = vector.shape_cast %31 : vector<16x16xf32> to vector<1x1x16x16xf32>
    tpu.vector_store %arg5[%c0_29, %c2, %c0_30, %c0_31], %34 {strides = array<i32>} : memref<1x4x16x16xf32, #tpu.memory_space<vmem>>, vector<1x1x16x16xf32>,
    %35 = vector.extract_strided_slice %6 {offsets = [0, 96], sizes = [16, 16], strides = [1, 1]} : vector<16x192xf32> to vector<16x16xf32>
    %c0_32 = arith.constant 0 : index
    %c2_33 = arith.constant 2 : index
    %c0_34 = arith.constant 0 : index
    %c0_35 = arith.constant 0 : index
    %36 = vector.load %arg6[%c0_32, %c2_33, %c0_34, %c0_35] : memref<1x4x16x16xf32, #tpu.memory_space<vmem>>, vector<1x1x16x16xf32>
    %37 = vector.shape_cast %36 : vector<1x1x16x16xf32> to vector<16x16xf32>
    %38 = vector.shape_cast %35 : vector<16x16xf32> to vector<1x1x16x16xf32>
    tpu.vector_store %arg6[%c0_32, %c2_33, %c0_34, %c0_35], %38 {strides = array<i32>} : memref<1x4x16x16xf32, #tpu.memory_space<vmem>>, vector<1x1x16x16xf32>,
    %39 = vector.extract_strided_slice %6 {offsets = [0, 160], sizes = [16, 16], strides = [1, 1]} : vector<16x192xf32> to vector<16x16xf32>
    %c0_36 = arith.constant 0 : index
    %c2_37 = arith.constant 2 : index
    %c0_38 = arith.constant 0 : index
    %c0_39 = arith.constant 0 : index
    %40 = vector.load %arg7[%c0_36, %c2_37, %c0_38, %c0_39] : memref<1x4x16x16xf32, #tpu.memory_space<vmem>>, vector<1x1x16x16xf32>
    %41 = vector.shape_cast %40 : vector<1x1x16x16xf32> to vector<16x16xf32>
    %42 = vector.shape_cast %39 : vector<16x16xf32> to vector<1x1x16x16xf32>
    tpu.vector_store %arg7[%c0_36, %c2_37, %c0_38, %c0_39], %42 {strides = array<i32>} : memref<1x4x16x16xf32, #tpu.memory_space<vmem>>, vector<1x1x16x16xf32>,
    %43 = vector.extract_strided_slice %6 {offsets = [0, 48], sizes = [16, 16], strides = [1, 1]} : vector<16x192xf32> to vector<16x16xf32>
    %c0_40 = arith.constant 0 : index
    %c3 = arith.constant 3 : index
    %c0_41 = arith.constant 0 : index
    %c0_42 = arith.constant 0 : index
    %44 = vector.load %arg5[%c0_40, %c3, %c0_41, %c0_42] : memref<1x4x16x16xf32, #tpu.memory_space<vmem>>, vector<1x1x16x16xf32>
    %45 = vector.shape_cast %44 : vector<1x1x16x16xf32> to vector<16x16xf32>
    %46 = vector.shape_cast %43 : vector<16x16xf32> to vector<1x1x16x16xf32>
    tpu.vector_store %arg5[%c0_40, %c3, %c0_41, %c0_42], %46 {strides = array<i32>} : memref<1x4x16x16xf32, #tpu.memory_space<vmem>>, vector<1x1x16x16xf32>,
    %47 = vector.extract_strided_slice %6 {offsets = [0, 112], sizes = [16, 16], strides = [1, 1]} : vector<16x192xf32> to vector<16x16xf32>
    %c0_43 = arith.constant 0 : index
    %c3_44 = arith.constant 3 : index
    %c0_45 = arith.constant 0 : index
    %c0_46 = arith.constant 0 : index
    %48 = vector.load %arg6[%c0_43, %c3_44, %c0_45, %c0_46] : memref<1x4x16x16xf32, #tpu.memory_space<vmem>>, vector<1x1x16x16xf32>
    %49 = vector.shape_cast %48 : vector<1x1x16x16xf32> to vector<16x16xf32>
    %50 = vector.shape_cast %47 : vector<16x16xf32> to vector<1x1x16x16xf32>
    tpu.vector_store %arg6[%c0_43, %c3_44, %c0_45, %c0_46], %50 {strides = array<i32>} : memref<1x4x16x16xf32, #tpu.memory_space<vmem>>, vector<1x1x16x16xf32>,
    %51 = vector.extract_strided_slice %6 {offsets = [0, 176], sizes = [16, 16], strides = [1, 1]} : vector<16x192xf32> to vector<16x16xf32>
    %c0_47 = arith.constant 0 : index
    %c3_48 = arith.constant 3 : index
    %c0_49 = arith.constant 0 : index
    %c0_50 = arith.constant 0 : index
    %52 = vector.load %arg7[%c0_47, %c3_48, %c0_49, %c0_50] : memref<1x4x16x16xf32, #tpu.memory_space<vmem>>, vector<1x1x16x16xf32>
    %53 = vector.shape_cast %52 : vector<1x1x16x16xf32> to vector<16x16xf32>
    %54 = vector.shape_cast %51 : vector<16x16xf32> to vector<1x1x16x16xf32>
    tpu.vector_store %arg7[%c0_47, %c3_48, %c0_49, %c0_50], %54 {strides = array<i32>} : memref<1x4x16x16xf32, #tpu.memory_space<vmem>>, vector<1x1x16x16xf32>,
    return
  }
  func.func @transform_0(%arg0: i32, %arg1: i32) -> (i32, i32, i32) {
    %c0_i32 = arith.constant 0 : i32
    %c0_i32_0 = arith.constant 0 : i32
    return %arg1, %arg0, %c0_i32 : i32, i32, i32
  }
  func.func @transform_1(%arg0: i32, %arg1: i32) -> (i32, i32) {
    %c0_i32 = arith.constant 0 : i32
    %c0_i32_0 = arith.constant 0 : i32
    %c0_i32_1 = arith.constant 0 : i32
    return %c0_i32, %c0_i32_0 : i32, i32
  }
  func.func @transform_2(%arg0: i32, %arg1: i32) -> (i32, i32) {
    %c0_i32 = arith.constant 0 : i32
    %c0_i32_0 = arith.constant 0 : i32
    %c0_i32_1 = arith.constant 0 : i32
    return %c0_i32, %c0_i32_0 : i32, i32
  }
  func.func @transform_3(%arg0: i32, %arg1: i32) -> (i32, i32, i32, i32) {
    %c0_i32 = arith.constant 0 : i32
    %c0_i32_0 = arith.constant 0 : i32
    %c0_i32_1 = arith.constant 0 : i32
    return %arg1, %c0_i32, %arg0, %c0_i32_0 : i32, i32, i32, i32
  }
  func.func @transform_4(%arg0: i32, %arg1: i32) -> (i32, i32, i32, i32) {
    %c0_i32 = arith.constant 0 : i32
    %c0_i32_0 = arith.constant 0 : i32
    %c0_i32_1 = arith.constant 0 : i32
    return %arg1, %c0_i32, %arg0, %c0_i32_0 : i32, i32, i32, i32
  }
  func.func @transform_5(%arg0: i32, %arg1: i32) -> (i32, i32, i32, i32) {
    %c0_i32 = arith.constant 0 : i32
    %c0_i32_0 = arith.constant 0 : i32
    %c0_i32_1 = arith.constant 0 : i32
    return %arg1, %c0_i32, %arg0, %c0_i32_0 : i32, i32, i32, i32
  }
}

module attributes {stable_mosaic.version = 11 : i64} {
  func.func @_qkv_proj_kernel(%arg0: i32, %arg1: i32, %arg2: memref<1x16x64xf32, #tpu.memory_space<vmem>>, %arg3: memref<64x192xf32, #tpu.memory_space<vmem>>, %arg4: memref<1x192xf32, #tpu.memory_space<vmem>>, %arg5: memref<1x4x16x16xf32, #tpu.memory_space<vmem>>, %arg6: memref<1x4x16x16xf32, #tpu.memory_space<vmem>>, %arg7: memref<1x4x16x16xf32, #tpu.memory_space<vmem>>) attributes {dimension_semantics = [#tpu.dimension_semantics<parallel>, #tpu.dimension_semantics<parallel>], iteration_bounds = array<i64: 1, 2>, scalar_prefetch = 0 : i64, scratch_operands = 0 : i64, tpu.core_type = #tpu.core_type<tc>, window_params = [{transform_indices = @transform_0, window_bounds = array<i64: 1, 16, 64>}, {pipeline_mode = #tpu.pipeline_mode<synchronous>, transform_indices = @transform_1, window_bounds = array<i64: 64, 192>}, {pipeline_mode = #tpu.pipeline_mode<synchronous>, transform_indices = @transform_2, window_bounds = array<i64: 1, 192>}, {transform_indices = @transform_3, window_bounds = array<i64: 1, 4, 16, 16>}, {transform_indices = @transform_4, window_bounds = array<i64: 1, 4, 16, 16>}, {transform_indices = @transform_5, window_bounds = array<i64: 1, 4, 16, 16>}]} {
    %c0 = arith.constant 0 : index
    %c0_0 = arith.constant 0 : index
    %c0_1 = arith.constant 0 : index
    %0 = vector.load %arg2[%c0, %c0_0, %c0_1] : memref<1x16x64xf32, #tpu.memory_space<vmem>>, vector<1x16x64xf32>
    %1 = vector.shape_cast %0 : vector<1x16x64xf32> to vector<16x64xf32>
    %c0_2 = arith.constant 0 : index
    %c0_3 = arith.constant 0 : index
    %2 = vector.load %arg3[%c0_2, %c0_3] : memref<64x192xf32, #tpu.memory_space<vmem>>, vector<64x192xf32>
    %cst = arith.constant dense<0.000000e+00> : vector<16x192xf32>
    %3 = tpu.matmul %1, %2, %cst {dimension_numbers = #tpu.dot_dimension_numbers<[1], [0], [0], [1], [0, 0, 1, 1], [], []>} : vector<16x64xf32>, vector<64x192xf32>, vector<16x192xf32> -> vector<16x192xf32>
    %c0_4 = arith.constant 0 : index
    %c0_5 = arith.constant 0 : index
    %4 = vector.load %arg4[%c0_4, %c0_5] : memref<1x192xf32, #tpu.memory_space<vmem>>, vector<1x192xf32>
    %5 = vector.broadcast %4 : vector<1x192xf32> to vector<16x192xf32>
    %6 = arith.addf %3, %5 : vector<16x192xf32>
    %7 = vector.extract_strided_slice %6 {offsets = [0, 0], sizes = [16, 16], strides = [1, 1]} : vector<16x192xf32> to vector<16x16xf32>
    %c0_6 = arith.constant 0 : index
    %c0_7 = arith.constant 0 : index
    %c0_8 = arith.constant 0 : index
    %c0_9 = arith.constant 0 : index
    %8 = vector.load %arg5[%c0_6, %c0_7, %c0_8, %c0_9] : memref<1x4x16x16xf32, #tpu.memory_space<vmem>>, vector<1x1x16x16xf32>
    %9 = vector.shape_cast %8 : vector<1x1x16x16xf32> to vector<16x16xf32>
    %10 = vector.shape_cast %7 : vector<16x16xf32> to vector<1x1x16x16xf32>
    tpu.vector_store %arg5[%c0_6, %c0_7, %c0_8, %c0_9], %10 {strides = array<i32>} : memref<1x4x16x16xf32, #tpu.memory_space<vmem>>, vector<1x1x16x16xf32>,
    %11 = vector.extract_strided_slice %6 {offsets = [0, 64], sizes = [16, 16], strides = [1, 1]} : vector<16x192xf32> to vector<16x16xf32>
    %c0_10 = arith.constant 0 : index
    %c0_11 = arith.constant 0 : index
    %c0_12 = arith.constant 0 : index
    %c0_13 = arith.constant 0 : index
    %12 = vector.load %arg6[%c0_10, %c0_11, %c0_12, %c0_13] : memref<1x4x16x16xf32, #tpu.memory_space<vmem>>, vector<1x1x16x16xf32>
    %13 = vector.shape_cast %12 : vector<1x1x16x16xf32> to vector<16x16xf32>
    %14 = vector.shape_cast %11 : vector<16x16xf32> to vector<1x1x16x16xf32>
    tpu.vector_store %arg6[%c0_10, %c0_11, %c0_12, %c0_13], %14 {strides = array<i32>} : memref<1x4x16x16xf32, #tpu.memory_space<vmem>>, vector<1x1x16x16xf32>,
    %15 = vector.extract_strided_slice %6 {offsets = [0, 128], sizes = [16, 16], strides = [1, 1]} : vector<16x192xf32> to vector<16x16xf32>
    %c0_14 = arith.constant 0 : index
    %c0_15 = arith.constant 0 : index
    %c0_16 = arith.constant 0 : index
    %c0_17 = arith.constant 0 : index
    %16 = vector.load %arg7[%c0_14, %c0_15, %c0_16, %c0_17] : memref<1x4x16x16xf32, #tpu.memory_space<vmem>>, vector<1x1x16x16xf32>
    %17 = vector.shape_cast %16 : vector<1x1x16x16xf32> to vector<16x16xf32>
    %18 = vector.shape_cast %15 : vector<16x16xf32> to vector<1x1x16x16xf32>
    tpu.vector_store %arg7[%c0_14, %c0_15, %c0_16, %c0_17], %18 {strides = array<i32>} : memref<1x4x16x16xf32, #tpu.memory_space<vmem>>, vector<1x1x16x16xf32>,
    %19 = vector.extract_strided_slice %6 {offsets = [0, 16], sizes = [16, 16], strides = [1, 1]} : vector<16x192xf32> to vector<16x16xf32>
    %c0_18 = arith.constant 0 : index
    %c1 = arith.constant 1 : index
    %c0_19 = arith.constant 0 : index
    %c0_20 = arith.constant 0 : index
    %20 = vector.load %arg5[%c0_18, %c1, %c0_19, %c0_20] : memref<1x4x16x16xf32, #tpu.memory_space<vmem>>, vector<1x1x16x16xf32>
    %21 = vector.shape_cast %20 : vector<1x1x16x16xf32> to vector<16x16xf32>
    %22 = vector.shape_cast %19 : vector<16x16xf32> to vector<1x1x16x16xf32>
    tpu.vector_store %arg5[%c0_18, %c1, %c0_19, %c0_20], %22 {strides = array<i32>} : memref<1x4x16x16xf32, #tpu.memory_space<vmem>>, vector<1x1x16x16xf32>,
    %23 = vector.extract_strided_slice %6 {offsets = [0, 80], sizes = [16, 16], strides = [1, 1]} : vector<16x192xf32> to vector<16x16xf32>
    %c0_21 = arith.constant 0 : index
    %c1_22 = arith.constant 1 : index
    %c0_23 = arith.constant 0 : index
    %c0_24 = arith.constant 0 : index
    %24 = vector.load %arg6[%c0_21, %c1_22, %c0_23, %c0_24] : memref<1x4x16x16xf32, #tpu.memory_space<vmem>>, vector<1x1x16x16xf32>
    %25 = vector.shape_cast %24 : vector<1x1x16x16xf32> to vector<16x16xf32>
    %26 = vector.shape_cast %23 : vector<16x16xf32> to vector<1x1x16x16xf32>
    tpu.vector_store %arg6[%c0_21, %c1_22, %c0_23, %c0_24], %26 {strides = array<i32>} : memref<1x4x16x16xf32, #tpu.memory_space<vmem>>, vector<1x1x16x16xf32>,
    %27 = vector.extract_strided_slice %6 {offsets = [0, 144], sizes = [16, 16], strides = [1, 1]} : vector<16x192xf32> to vector<16x16xf32>
    %c0_25 = arith.constant 0 : index
    %c1_26 = arith.constant 1 : index
    %c0_27 = arith.constant 0 : index
    %c0_28 = arith.constant 0 : index
    %28 = vector.load %arg7[%c0_25, %c1_26, %c0_27, %c0_28] : memref<1x4x16x16xf32, #tpu.memory_space<vmem>>, vector<1x1x16x16xf32>
    %29 = vector.shape_cast %28 : vector<1x1x16x16xf32> to vector<16x16xf32>
    %30 = vector.shape_cast %27 : vector<16x16xf32> to vector<1x1x16x16xf32>
    tpu.vector_store %arg7[%c0_25, %c1_26, %c0_27, %c0_28], %30 {strides = array<i32>} : memref<1x4x16x16xf32, #tpu.memory_space<vmem>>, vector<1x1x16x16xf32>,
    %31 = vector.extract_strided_slice %6 {offsets = [0, 32], sizes = [16, 16], strides = [1, 1]} : vector<16x192xf32> to vector<16x16xf32>
    %c0_29 = arith.constant 0 : index
    %c2 = arith.constant 2 : index
    %c0_30 = arith.constant 0 : index
    %c0_31 = arith.constant 0 : index
    %32 = vector.load %arg5[%c0_29, %c2, %c0_30, %c0_31] : memref<1x4x16x16xf32, #tpu.memory_space<vmem>>, vector<1x1x16x16xf32>
    %33 = vector.shape_cast %32 : vector<1x1x16x16xf32> to vector<16x16xf32>
    %34 = vector.shape_cast %31 : vector<16x16xf32> to vector<1x1x16x16xf32>
    tpu.vector_store %arg5[%c0_29, %c2, %c0_30, %c0_31], %34 {strides = array<i32>} : memref<1x4x16x16xf32, #tpu.memory_space<vmem>>, vector<1x1x16x16xf32>,
    %35 = vector.extract_strided_slice %6 {offsets = [0, 96], sizes = [16, 16], strides = [1, 1]} : vector<16x192xf32> to vector<16x16xf32>
    %c0_32 = arith.constant 0 : index
    %c2_33 = arith.constant 2 : index
    %c0_34 = arith.constant 0 : index
    %c0_35 = arith.constant 0 : index
    %36 = vector.load %arg6[%c0_32, %c2_33, %c0_34, %c0_35] : memref<1x4x16x16xf32, #tpu.memory_space<vmem>>, vector<1x1x16x16xf32>
    %37 = vector.shape_cast %36 : vector<1x1x16x16xf32> to vector<16x16xf32>
    %38 = vector.shape_cast %35 : vector<16x16xf32> to vector<1x1x16x16xf32>
    tpu.vector_store %arg6[%c0_32, %c2_33, %c0_34, %c0_35], %38 {strides = array<i32>} : memref<1x4x16x16xf32, #tpu.memory_space<vmem>>, vector<1x1x16x16xf32>,
    %39 = vector.extract_strided_slice %6 {offsets = [0, 160], sizes = [16, 16], strides = [1, 1]} : vector<16x192xf32> to vector<16x16xf32>
    %c0_36 = arith.constant 0 : index
    %c2_37 = arith.constant 2 : index
    %c0_38 = arith.constant 0 : index
    %c0_39 = arith.constant 0 : index
    %40 = vector.load %arg7[%c0_36, %c2_37, %c0_38, %c0_39] : memref<1x4x16x16xf32, #tpu.memory_space<vmem>>, vector<1x1x16x16xf32>
    %41 = vector.shape_cast %40 : vector<1x1x16x16xf32> to vector<16x16xf32>
    %42 = vector.shape_cast %39 : vector<16x16xf32> to vector<1x1x16x16xf32>
    tpu.vector_store %arg7[%c0_36, %c2_37, %c0_38, %c0_39], %42 {strides = array<i32>} : memref<1x4x16x16xf32, #tpu.memory_space<vmem>>, vector<1x1x16x16xf32>,
    %43 = vector.extract_strided_slice %6 {offsets = [0, 48], sizes = [16, 16], strides = [1, 1]} : vector<16x192xf32> to vector<16x16xf32>
    %c0_40 = arith.constant 0 : index
    %c3 = arith.constant 3 : index
    %c0_41 = arith.constant 0 : index
    %c0_42 = arith.constant 0 : index
    %44 = vector.load %arg5[%c0_40, %c3, %c0_41, %c0_42] : memref<1x4x16x16xf32, #tpu.memory_space<vmem>>, vector<1x1x16x16xf32>
    %45 = vector.shape_cast %44 : vector<1x1x16x16xf32> to vector<16x16xf32>
    %46 = vector.shape_cast %43 : vector<16x16xf32> to vector<1x1x16x16xf32>
    tpu.vector_store %arg5[%c0_40, %c3, %c0_41, %c0_42], %46 {strides = array<i32>} : memref<1x4x16x16xf32, #tpu.memory_space<vmem>>, vector<1x1x16x16xf32>,
    %47 = vector.extract_strided_slice %6 {offsets = [0, 112], sizes = [16, 16], strides = [1, 1]} : vector<16x192xf32> to vector<16x16xf32>
    %c0_43 = arith.constant 0 : index
    %c3_44 = arith.constant 3 : index
    %c0_45 = arith.constant 0 : index
    %c0_46 = arith.constant 0 : index
    %48 = vector.load %arg6[%c0_43, %c3_44, %c0_45, %c0_46] : memref<1x4x16x16xf32, #tpu.memory_space<vmem>>, vector<1x1x16x16xf32>
    %49 = vector.shape_cast %48 : vector<1x1x16x16xf32> to vector<16x16xf32>
    %50 = vector.shape_cast %47 : vector<16x16xf32> to vector<1x1x16x16xf32>
    tpu.vector_store %arg6[%c0_43, %c3_44, %c0_45, %c0_46], %50 {strides = array<i32>} : memref<1x4x16x16xf32, #tpu.memory_space<vmem>>, vector<1x1x16x16xf32>,
    %51 = vector.extract_strided_slice %6 {offsets = [0, 176], sizes = [16, 16], strides = [1, 1]} : vector<16x192xf32> to vector<16x16xf32>
    %c0_47 = arith.constant 0 : index
    %c3_48 = arith.constant 3 : index
    %c0_49 = arith.constant 0 : index
    %c0_50 = arith.constant 0 : index
    %52 = vector.load %arg7[%c0_47, %c3_48, %c0_49, %c0_50] : memref<1x4x16x16xf32, #tpu.memory_space<vmem>>, vector<1x1x16x16xf32>
    %53 = vector.shape_cast %52 : vector<1x1x16x16xf32> to vector<16x16xf32>
    %54 = vector.shape_cast %51 : vector<16x16xf32> to vector<1x1x16x16xf32>
    tpu.vector_store %arg7[%c0_47, %c3_48, %c0_49, %c0_50], %54 {strides = array<i32>} : memref<1x4x16x16xf32, #tpu.memory_space<vmem>>, vector<1x1x16x16xf32>,
    return
  }
  func.func @transform_0(%arg0: i32, %arg1: i32) -> (i32, i32, i32) {
    %c0_i32 = arith.constant 0 : i32
    %c0_i32_0 = arith.constant 0 : i32
    return %arg1, %arg0, %c0_i32 : i32, i32, i32
  }
  func.func @transform_1(%arg0: i32, %arg1: i32) -> (i32, i32) {
    %c0_i32 = arith.constant 0 : i32
    %c0_i32_0 = arith.constant 0 : i32
    %c0_i32_1 = arith.constant 0 : i32
    return %c0_i32, %c0_i32_0 : i32, i32
  }
  func.func @transform_2(%arg0: i32, %arg1: i32) -> (i32, i32) {
    %c0_i32 = arith.constant 0 : i32
    %c0_i32_0 = arith.constant 0 : i32
    %c0_i32_1 = arith.constant 0 : i32
    return %c0_i32, %c0_i32_0 : i32, i32
  }
  func.func @transform_3(%arg0: i32, %arg1: i32) -> (i32, i32, i32, i32) {
    %c0_i32 = arith.constant 0 : i32
    %c0_i32_0 = arith.constant 0 : i32
    %c0_i32_1 = arith.constant 0 : i32
    return %arg1, %c0_i32, %arg0, %c0_i32_0 : i32, i32, i32, i32
  }
  func.func @transform_4(%arg0: i32, %arg1: i32) -> (i32, i32, i32, i32) {
    %c0_i32 = arith.constant 0 : i32
    %c0_i32_0 = arith.constant 0 : i32
    %c0_i32_1 = arith.constant 0 : i32
    return %arg1, %c0_i32, %arg0, %c0_i32_0 : i32, i32, i32, i32
  }
  func.func @transform_5(%arg0: i32, %arg1: i32) -> (i32, i32, i32, i32) {
    %c0_i32 = arith.constant 0 : i32
    %c0_i32_0 = arith.constant 0 : i32
    %c0_i32_1 = arith.constant 0 : i32
    return %arg1, %c0_i32, %arg0, %c0_i32_0 : i32, i32, i32, i32
  }
}

</mosaic_0001>

<bundles_post_ra>
// kernel: tpu_custom_call.1
= control target key start
LH: loop header
LB: loop body
LE: loop exit
PB: predicated region body
PF: predicated region fallthrough
CT: control target
= control target key end

     0   :  { %s1460_s0 = inlined_call_operand.hbm [shape: f32[2,16,64], index: 0, kind: input, shape index: {}]   ;;  %s1461_s1 = inlined_call_operand.hbm [shape: f32[64,192], index: 1, kind: input, shape index: {}]   ;;  %s1462_s2 = inlined_call_operand.hbm [shape: f32[1,192], index: 2, kind: input, shape index: {}]   ;;  %s1463_s3 = inlined_call_operand.hbm [shape: f32[2,4,16,16], index: 3, kind: output, shape index: {0}]   ;;  %s1464_s4 = inlined_call_operand.hbm [shape: f32[2,4,16,16], index: 4, kind: output, shape index: {1}]   ;;  %s1465_s5 = inlined_call_operand.hbm [shape: f32[2,4,16,16], index: 5, kind: output, shape index: {2}]  }
   0x1   :  { %1468 = sst [smem:[#allocation17_spill]] %s1461_s1 }
   0x2   :  { %1469 = sst [smem:[#allocation18_spill]] %s1462_s2 }
   0x3   :  { %11 = vsyncpa [#allocation3], 0 }
   0x4   :  { %13 = vsyncpa [#allocation3 + $0x1], 0 }
   0x5   :  { %14 = vsyncpa [#allocation6], 0 }
   0x6   :  { %15 = vsyncpa [#allocation4], 0 }
   0x7   :  { %17 = vsyncpa [#allocation4 + $0x1], 0 }
   0x8   :  { %18 = vsyncpa [#allocation10], 0 }
   0x9   :  { %20 = vsyncpa [#allocation10 + $0x1], 0  ;;  %s1194_s18 = smov 0   ;;  %s1196_s19 = smov 0  }
   0xa   :  { %s1198_s20 = smov 0   ;;  %s1200_s21 = smov 0  }
   0xb   :  { %s1202_s22 = smov 0   ;;  %s1204_s23 = smov 0  }
   0xc LB: > { %s1225_s24 = sadd.s32 4294967295, %s1147_s23   ;;  %s1466_s25 = sadd.s32 4294967294, %s1147_s23   ;;  %s1147_s23 = sphi %s1204_s23, %s26_s23   ;;  %s1143_s22 = sphi %s1202_s22, %s1484_s22   ;;  %s1139_s21 = sphi %s1200_s21, %s1483_s21   ;;  %s1135_s20 = sphi %s1198_s20, %s1482_s20   ;;  %s1131_s19 = sphi %s1196_s19, %s1481_s19   ;;  %s1127_s18 = sphi %s1194_s18, %s1480_s18  }
   0xd   : > { %p60_p0 = scmp.ne.s32.totalorder %s1131_s19, %s1127_s18  ;;  %p61_p1 = scmp.eq.s32.totalorder %s1225_s24, 0 }
   0xe   : > { %p128_p2 = scmp.eq.s32.totalorder %s1225_s24, 1  ;;  %p134_p3 = scmp.eq.s32.totalorder %s1466_s25, 1 }
   0xf   : > { %p1236_p4 = por %p61_p1, %p60_p0  ;;  %p738_p5 = scmp.ge.s32.totalorder %s1147_s23, 1 }
  0x10   : > { %p1241_p6 = por %p134_p3, %p60_p0  ;;  %p197_p7 = scmp.lt.s32.totalorder %s1147_s23, 3 }
  0x11   : > { %s1472_s1 = sld [smem:[#allocation17_spill]]  ;;  %s1149_s7 = smov [#allocation5]  }
  0x12   : > { %p1249_p8 = pnand %p738_p5, %p197_p7  ;;  %s210_s8 = sshll.u32 %s1149_s7, 4  ;;  %s211_s8 = int_to_ptr.vmem [resolvable:$true] %s210_s8 }
  0x13   : > { %p741_p11 = scmp.ge.s32.totalorder %s1147_s23, 2  ;;  %s1474_s2 = sld [smem:[#allocation18_spill]] }
  0x14   : > { %p821_p9 = pneg %p1249_p8  ;;  %s1150_s12 = smov 256  }
  0x15   : > { %s1151_s13 = smov 16   ;;  %s1152_s14 = smov [#allocation7]  }
  0x16   : > { %p822_p10 = pnand %p821_p9, %p61_p1  ;;  %s225_s15 = sshll.u32 %s1152_s14, 4  ;;  %s226_s15 = int_to_ptr.vmem [resolvable:$true] %s225_s15 }
  0x17   : > { %s208_s30 = sshll.u32 %s1472_s1, 4  ;;  %s35_s16 = sadd.s32 1, %s1143_s22  ;;  %s209_s30 = int_to_ptr.hbm [resolvable:$true] %s208_s30 }
  0x18   : > { %824 = dma.hbm_to_vmem [thread:$0]  (!%p822_p10), %s209_s30, 2048, %s211_s8, [#allocation6], %s1150_s12, %s1150_s12, %s1151_s13  }
  0x19   : > { %s223_s11 = sshll.u32 %s1474_s2, 4  ;;  %s47_s17 = sadd.s32 1, %s1135_s20  ;;  %s224_s11 = int_to_ptr.hbm [resolvable:$true] %s223_s11 }
  0x1a   : > { %827 = dma.hbm_to_vmem [thread:$0]  (!%p822_p10), %s224_s11, 32, %s226_s15, [#allocation6]  }
  0x1b   : > { %p36_p12 = scmp.ge.s32.totalorder %s35_s16, 2  ;;  %p54_p13 = scmp.ne.s32.totalorder %s1135_s20, %s1131_s19 }
  0x1c   : > { %p55_p0 = scmp.eq.s32.totalorder %s1147_s23, 0  ;;  %p844_p3 = scmp.lt.s32.totalorder %s1147_s23, 2 }
  0x1d   : > { %s1486_s16 = smov (%p36_p12, %s35_s16), 0  ;;  %p1275_p7 = por %p128_p2, %p54_p13 }
  0x1e   : > { %1475 = sst [smem:[#allocation16_spill]] %s1486_s16  ;;  %p1269_p5 = por %p55_p0, %p54_p13 }
  0x1f   : > { %s42_s30 = ssub.s32 %s1143_s22, %s1486_s16  ;;  %s236_s7 = sand.u32 1, %s1135_s20  }
  0x20   : > { %p45_p9 = scmp.eq.s32.totalorder %s42_s30, 0  ;;  %s742_s8 = sshll.u32 %s236_s7, 4 }
  0x21   : > { %s785_s9 = sshll.u32 %s1143_s22, 4  ;;  %s240_s15 = scalar_lea.vmem [#allocation2], %s742_s8 }
  0x22   : > { %s1284_s10 = scalar_select %p45_p9, %s1135_s20, %s47_s17  }
  0x23   : > { %s247_s13 = scalar_lea.hbm %s1460_s0, %s785_s9  ;;  %s250_s25 = sshll.u32 %s240_s15, 4  ;;  %s251_s25 = int_to_ptr.vmem [resolvable:$true] %s250_s25 }
  0x24   : > { %s248_s14 = sshll.u32 %s247_s13, 4  ;;  %p829_p2 = pnand %p844_p3, %p1269_p5  ;;  %s249_s14 = int_to_ptr.hbm [resolvable:$true] %s248_s14 }
  0x25   : > { %s237_s1 = scalar_lea.sflag [#allocation3], %s236_s7  ;;  %s1153_s2 = smov 128  }
  0x26   : > { %s1154_s16 = smov 8   ;;  %262 = sbr.rel (%p1249_p8) target bundleno = 369 (0x171), region = 32 }
  0x27   : > { %831 = dma.hbm_to_vmem [thread:$0]  (!%p829_p2), %s249_s14, 256, %s251_s25, %s237_s1, %s1153_s2, %s1153_s2, %s1154_s16  }
  0x28   : > { %s1296_s17 = sand.u32 (!%p1249_p8), 1, %s1131_s19  }
  0x29   : > { %s746_s30 = sshll.u32 (!%p1249_p8), %s1296_s17, 4  ;;  %s265_s8 = scalar_lea.sflag (!%p1249_p8), [#allocation3], %s1296_s17 }
  0x2a   : > { %s1300_s9 = scalar_lea.vmem (!%p1249_p8), [#allocation2], %s746_s30 }
  0x2b   : > { %1110 = dma.done.wait (%p1236_p4), %s265_s8, 256  }
  0x2c   : > { %1112 = vsyncadd (%p1236_p4), %s265_s8, 4294967040 }
  0x2d   : > { %1114 = dma.done.wait (%p61_p1), [#allocation6], 2080  }
  0x2e   : > { %1116 = vsyncadd (%p61_p1), [#allocation6], 4294965216  ;;  %v336_v0 = vld [vmem:[#allocation5 + $0x70] sm:$0xff]  ;;  %v334_v1 = vld [vmem:[#allocation5 + $0x60] sm:$0xff]  ;;  %vm344_vm0 = vcmask 523264   ;;  %s1313_s1 = sshll.u32 %s1296_s17, 6 }
  0x2f   : > { %359 = vmatpush.msra.mxu0 %v336_v0  ;;  %v337_v2 = vld [vmem:[#allocation5 + $0x78] sm:$0xff]  ;;  %789 = vmatpush.msra.mxu2 %v336_v0  ;;  %v332_v3 = vld [vmem:[#allocation5 + $0x50] sm:$0xff]  ;;  %v335_v4 = vld [vmem:[#allocation5 + $0x68] sm:$0xff]  ;;  %vm397_vm1 = vcmask 130048   ;;  %s1155_s2 = smov 48   ;;  %s1156_s25 = smov 112  }
  0x30   : > { %382 = vmatpush.msra.mxu1 %v337_v2  ;;  %797 = vmatpush.msra.mxu3 %v337_v2  ;;  %v333_v5 = vld [vmem:[#allocation5 + $0x58] sm:$0xff]  ;;  %v330_v6 = vld [vmem:[#allocation5 + $0x40] sm:$0xff]  ;;  %v331_v7 = vld [vmem:[#allocation5 + $0x48] sm:$0xff]  ;;  %s1316_s26 = scalar_lea.vmem [#allocation8], %s1313_s1  ;;  %s1157_s6 = smov 64  }
  0x31   : > { %360 = vmatpush.msra.mxu0 %v334_v1  ;;  %790 = vmatpush.msra.mxu2 %v334_v1  ;;  %v328_v8 = vld [vmem:[#allocation5 + $0x30] sm:$0xff]  ;;  %v329_v9 = vld [vmem:[#allocation5 + $0x38] sm:$0xff]  ;;  %v326_v10 = vld [vmem:[#allocation5 + $0x20] sm:$0xff]  ;;  %s1321_s16 = scalar_lea.vmem [#allocation11], %s1313_s1  ;;  %s1158_s28 = smov 96  }
  0x32   : > { %383 = vmatpush.msra.mxu1 %v335_v4  ;;  %798 = vmatpush.msra.mxu3 %v335_v4  ;;  %v327_v11 = vld [vmem:[#allocation5 + $0x28] sm:$0xff]  ;;  %v324_v12 = vld [vmem:[#allocation5 + $0x10] sm:$0xff]  ;;  %v325_v13 = vld [vmem:[#allocation5 + $0x18] sm:$0xff]  ;;  %s1159_s7 = smov 32   ;;  %s1160_s11 = smov 80  }
  0x33   : > { %361 = vmatpush.msra.mxu0 %v332_v3  ;;  %791 = vmatpush.msra.mxu2 %v332_v3  ;;  %v322_v14 = vld [vmem:[#allocation5] sm:$0xff]  ;;  %v323_v16 = vld [vmem:[#allocation5 + $0x8] sm:$0xff]  ;;  %s1161_s12 = smov 16   ;;  %s1330_s13 = scalar_lea.vmem [#allocation9], %s1313_s1 }
  0x34   : > { %384 = vmatpush.msra.mxu1 %v333_v5  ;;  %799 = vmatpush.msra.mxu3 %v333_v5  ;;  %v320_v15 = vld [vmem:[%s1300_s9] sm:$0xff]  ;;  %v321_v17 = vld [vmem:[%s1300_s9 + $0x8] sm:$0xff]  ;;  %s1357_s14 = sshll.u32 %s1139_s21, 6  ;;  %s539_s9 = sshll.u32 %s1330_s13, 4  ;;  %s540_s9 = int_to_ptr.vmem [resolvable:$true] %s539_s9 }
  0x35   : > { %362 = vmatpush.msra.mxu0 %v330_v6  ;;  %792 = vmatpush.msra.mxu2 %v330_v6  ;;  %v338_v18 = vld [vmem:[#allocation7] sm:$0x3]  ;;  %s538_s8 = scalar_lea.hbm %s1464_s4, %s1357_s14  ;;  %s500_s1 = sand.u32 1, %s1225_s24  }
  0x36   : > { %385 = vmatpush.msra.mxu1 %v331_v7  ;;  %800 = vmatpush.msra.mxu3 %v331_v7  ;;  %v340_v19 = vperm.slane %v338_v18, 0  ;;  %v341_v20 = vperm.slane %v338_v18, 1  ;;  %s1021_s15 = scalar_lea.hbm %s1464_s4, 128 }
  0x37   : > { %363 = vmatpush.msra.mxu0 %v328_v8  ;;  %793 = vmatpush.msra.mxu2 %v328_v8 }
  0x38   : > { %386 = vmatpush.msra.mxu1 %v329_v9  ;;  %801 = vmatpush.msra.mxu3 %v329_v9 }
  0x39   : > { %364 = vmatpush.msra.mxu0 %v326_v10  ;;  %794 = vmatpush.msra.mxu2 %v326_v10 }
  0x3a   : > { %387 = vmatpush.msra.mxu1 %v327_v11  ;;  %802 = vmatpush.msra.mxu3 %v327_v11 }
  0x3b   : > { %365 = vmatpush.msra.mxu0 %v324_v12  ;;  %795 = vmatpush.msra.mxu2 %v324_v12 }
  0x3c   : > { %388 = vmatpush.msra.mxu1 %v325_v13  ;;  %803 = vmatpush.msra.mxu3 %v325_v13 }
  0x3d   : > { %366 = vmatpush.msra.mxu0 %v322_v14  ;;  %796 = vmatpush.msra.mxu2 %v322_v14 }
  0x3e   : > { %752 = vmatmul.msk.f32.vlgmr.msra.gmra.mxu0 %vm344_vm0, %v320_v15  ;;  %389 = vmatpush.msra.mxu1 %v323_v16 }
  0x3f   : > { %754 = vmatmul.msk.f32.vlgmr.msra.gmra.mxu1 %vm344_vm0, %v320_v15  ;;  %753 = vmatmul.msk.f32.vlgmr.msra.gmra.mxu2 %vm344_vm0, %v321_v17 }
  0x40   : > { %804 = vmatpush.msra.mxu3 %v323_v16 }
  0x41   : > { %755 = vmatmul.msk.f32.vlgmr.msra.gmra.mxu3 %vm344_vm0, %v321_v17 }
  0xbb   : > { %v368_v21 = vpop.f32.mrf.mxu0 }
  0xbc   : > { %v369_v22 = vadd.f32 %v368_v21, %v340_v19  ;;  %v391_v23 = vpop.f32.mrf.mxu1 }
  0xbd   : > { %v392_v24 = vadd.f32 %v391_v23, %v341_v20 }
  0xbe   : > { %421 = vrot.lane.b32.xlu2 %v369_v22, %s1155_s2  ;;  %412 = vrot.lane.b32.xlu1 %v369_v22, %s1156_s25  ;;  %398 = vst.msk [vmem:[%s1316_s26] sm:$0xff] %vm397_vm1, %v369_v22 }
  0xbf   : > { %402 = vrot.lane.b32.xlu0 %v369_v22, %s1157_s6  ;;  %410 = vst.msk [vmem:[%s1321_s16] sm:$0xff] %vm397_vm1, %v392_v24 }
  0xc2   : > { %v371_v25 = vpop.f32.mrf.mxu2 }
  0xc3   : > { %v372_v26 = vadd.f32 %v371_v25, %v340_v19 }
  0xc4   : > { %v394_v27 = vpop.f32.mrf.mxu3 }
  0xc5   : > { %v395_v28 = vadd.f32 %v394_v27, %v341_v20  ;;  %399 = vst.msk [vmem:[%s1316_s26 + $0x8] sm:$0xff] %vm397_vm1, %v372_v26 }
  0xc6   : > { %459 = vrot.lane.b32.xlu2 %v392_v24, %s1158_s28  ;;  %450 = vrot.lane.b32.xlu1 %v369_v22, %s1159_s7 }
  0xc7   : > { %432 = vrot.lane.b32.xlu0 %v392_v24, %s1156_s25  ;;  %411 = vst.msk [vmem:[%s1321_s16 + $0x8] sm:$0xff] %vm397_vm1, %v395_v28 }
  0xce   : > { %423 = vrot.lane.b32.xlu2 %v372_v26, %s1155_s2  ;;  %468 = vrot.lane.b32.xlu1 %v369_v22, %s1160_s11  ;;  %s541_s2 = sshll.u32 %s538_s8, 4  ;;  %s542_s2 = int_to_ptr.hbm [resolvable:$true] %s541_s2 }
  0xcf   : > { %477 = vrot.lane.b32.xlu0 %v369_v22, %s1161_s12 }
  0xd6   : > { %452 = vrot.lane.b32.xlu2 %v372_v26, %s1159_s7  ;;  %414 = vrot.lane.b32.xlu1 %v372_v26, %s1156_s25  ;;  %s1015_s7 = sshra.s32 %s542_s2, 4  ;;  %s1016_s7 = int_to_ptr.hbm [resolvable:$true] %s1015_s7 }
  0xd7   : > { %441 = vrot.lane.b32.xlu0 %v369_v22, %s1158_s28  ;;  %p1022_p10 = scmp.lt.s32.totalorder %s1016_s7, %s1464_s4 }
  0xde   : > { %434 = vrot.lane.b32.xlu2 %v395_v28, %s1156_s25  ;;  %479 = vrot.lane.b32.xlu1 %v372_v26, %s1161_s12 }
  0xdf   : > { %404 = vrot.lane.b32.xlu0 %v372_v26, %s1157_s6  ;;  %s519_s6 = scalar_lea.hbm %s1463_s3, %s1357_s14 }
  0xe6   : > { %470 = vrot.lane.b32.xlu2 %v372_v26, %s1160_s11  ;;  %443 = vrot.lane.b32.xlu1 %v372_v26, %s1158_s28 }
  0xe7   : > { %461 = vrot.lane.b32.xlu0 %v395_v28, %s1158_s28  ;;  %s1377_s28 = scalar_lea.sflag [#allocation10], %s500_s1 }
  0xee   : > { %488 = vrot.lane.b32.xlu1 %v395_v28, %s1160_s11 }
  0xef   : > { %486 = vrot.lane.b32.xlu0 %v392_v24, %s1160_s11  ;;  %s1017_s11 = scalar_lea.hbm %s1016_s7, 64 }
  0xf0   : > { %p1018_p1 = scmp.ne.s32.totalorder %s1016_s7, %s1017_s11  ;;  %p1023_p12 = scmp.lt.s32.totalorder %s1021_s15, %s1017_s11 }
  0xf2   : > { %p1019_p4 = pnand %p1018_p1, %p1275_p7  ;;  %p1024_p13 = por %p1023_p12, %p1022_p10 }
  0xf4   : > { %p1020_p8 = pneg %p1019_p4 }
  0xf6   : > { %p1025_p0 = pnand %p1024_p13, %p1020_p8 }
 0x118   : > { %v422_v29 = vpop.permute.xlu2 %421 }
 0x119   : > { %758 = vst.msk [vmem:[%s1330_s13 + $0x10] sm:$0xff] %vm397_vm1, %v422_v29 }
 0x120   : > { %v460_v30 = vpop.permute.xlu2 %459 }
 0x121   : > { %766 = vst.msk [vmem:[%s1321_s16 + $0x20] sm:$0xff] %vm397_vm1, %v460_v30 }
 0x128   : > { %v424_v31 = vpop.permute.xlu2 %423 }
 0x129   : > { %759 = vst.msk [vmem:[%s1330_s13 + $0x18] sm:$0xff] %vm397_vm1, %v424_v31 }
 0x130   : > { %v453_v32 = vpop.permute.xlu2 %452  ;;  %v413_v33 = vpop.permute.xlu1 %412 }
 0x131   : > { %765 = vst.msk [vmem:[%s1330_s13 + $0x28] sm:$0xff] %vm397_vm1, %v453_v32  ;;  %v403_v34 = vpop.permute.xlu0 %402 }
 0x132   : > { %756 = vst.msk [vmem:[%s1316_s26 + $0x10] sm:$0xff] %vm397_vm1, %v413_v33 }
 0x133   : > { %408 = vst.msk [vmem:[%s1330_s13] sm:$0xff] %vm397_vm1, %v403_v34 }
 0x138   : > { %v435_v35 = vpop.permute.xlu2 %434  ;;  %v451_v36 = vpop.permute.xlu1 %450 }
 0x139   : > { %761 = vst.msk [vmem:[%s1321_s16 + $0x18] sm:$0xff] %vm397_vm1, %v435_v35  ;;  %v433_v37 = vpop.permute.xlu0 %432 }
 0x13a   : > { %764 = vst.msk [vmem:[%s1330_s13 + $0x20] sm:$0xff] %vm397_vm1, %v451_v36 }
 0x13b   : > { %760 = vst.msk [vmem:[%s1321_s16 + $0x10] sm:$0xff] %vm397_vm1, %v433_v37 }
 0x140   : > { %v471_v38 = vpop.permute.xlu2 %470  ;;  %v469_v39 = vpop.permute.xlu1 %468 }
 0x141   : > { %769 = vst.msk [vmem:[%s1316_s26 + $0x38] sm:$0xff] %vm397_vm1, %v471_v38  ;;  %v478_v40 = vpop.permute.xlu0 %477 }
 0x142   : > { %768 = vst.msk [vmem:[%s1316_s26 + $0x30] sm:$0xff] %vm397_vm1, %v469_v39 }
 0x143   : > { %770 = vst.msk [vmem:[%s1330_s13 + $0x30] sm:$0xff] %vm397_vm1, %v478_v40 }
 0x148   : > { %v415_v41 = vpop.permute.xlu1 %414 }
 0x149   : > { %757 = vst.msk [vmem:[%s1316_s26 + $0x18] sm:$0xff] %vm397_vm1, %v415_v41  ;;  %v442_v42 = vpop.permute.xlu0 %441 }
 0x14a   : > { %762 = vst.msk [vmem:[%s1316_s26 + $0x20] sm:$0xff] %vm397_vm1, %v442_v42 }
 0x150   : > { %v480_v43 = vpop.permute.xlu1 %479 }
 0x151   : > { %771 = vst.msk [vmem:[%s1330_s13 + $0x38] sm:$0xff] %vm397_vm1, %v480_v43  ;;  %v405_v44 = vpop.permute.xlu0 %404 }
 0x152   : > { %409 = vst.msk [vmem:[%s1330_s13 + $0x8] sm:$0xff] %vm397_vm1, %v405_v44 }
 0x153   : > { %1028 = shalt.err (!%p1025_p0)
}
 0x154   : > { %s1162_s13 = smov 128   ;;  %s1163_s1 = smov 8  }
 0x155   : > { %816 = dma.vmem_to_hbm [thread:$0]  (%p1275_p7), %s540_s9, 1024, %s542_s2, %s1377_s28, %s1162_s13, %s1162_s13, %s1163_s1  }
 0x156   : > { %s520_s21 = sshll.u32 %s1316_s26, 4  ;;  %s522_s25 = sshll.u32 %s519_s6, 4  ;;  %s521_s21 = int_to_ptr.vmem [resolvable:$true] %s520_s21  ;;  %s523_s25 = int_to_ptr.hbm [resolvable:$true] %s522_s25 }
 0x157   : > { %s557_s24 = scalar_lea.hbm %s1465_s5, %s1357_s14  ;;  %s496_s12 = scalar_lea.sflag [#allocation4], %s1296_s17 }
 0x158   : > { %v444_v45 = vpop.permute.xlu1 %443  ;;  %s1043_s15 = sshra.s32 %s523_s25, 4  ;;  %s1049_s6 = scalar_lea.hbm %s1463_s3, 128  ;;  %s1044_s15 = int_to_ptr.hbm [resolvable:$true] %s1043_s15 }
 0x159   : > { %763 = vst.msk [vmem:[%s1316_s26 + $0x28] sm:$0xff] %vm397_vm1, %v444_v45  ;;  %v462_v46 = vpop.permute.xlu0 %461  ;;  %s1045_s30 = scalar_lea.hbm %s1044_s15, 64  ;;  %p1050_p2 = scmp.lt.s32.totalorder %s1044_s15, %s1463_s3 }
 0x15a   : > { %767 = vst.msk [vmem:[%s1321_s16 + $0x28] sm:$0xff] %vm397_vm1, %v462_v46  ;;  %p1046_p3 = scmp.ne.s32.totalorder %s1044_s15, %s1045_s30  ;;  %p1051_p1 = scmp.lt.s32.totalorder %s1049_s6, %s1045_s30 }
 0x15c   : > { %p1047_p5 = pnand %p1046_p3, %p1275_p7  ;;  %p1052_p4 = por %p1051_p1, %p1050_p2 }
 0x15e   : > { %p1048_p9 = pneg %p1047_p5 }
 0x160   : > { %p1053_p8 = pnand %p1052_p4, %p1048_p9 }
 0x162   : > { %1056 = shalt.err (!%p1053_p8)
}
 0x163   : > { %815 = dma.vmem_to_hbm [thread:$0]  (%p1275_p7), %s521_s21, 1024, %s523_s25, %s496_s12, %s1162_s13, %s1162_s13, %s1163_s1   ;;  %v489_v47 = vpop.permute.xlu1 %488  ;;  %v487_v48 = vpop.permute.xlu0 %486 }
 0x164   : > { %s558_s17 = sshll.u32 %s1321_s16, 4  ;;  %s560_s14 = sshll.u32 %s557_s24, 4  ;;  %773 = vst.msk [vmem:[%s1321_s16 + $0x38] sm:$0xff] %vm397_vm1, %v489_v47  ;;  %s559_s17 = int_to_ptr.vmem [resolvable:$true] %s558_s17  ;;  %s561_s14 = int_to_ptr.hbm [resolvable:$true] %s560_s14 }
 0x165   : > { %772 = vst.msk [vmem:[%s1321_s16 + $0x30] sm:$0xff] %vm397_vm1, %v487_v48  ;;  %s1071_s7 = sshra.s32 %s561_s14, 4  ;;  %s1077_s21 = scalar_lea.hbm %s1465_s5, 128  ;;  %s1072_s7 = int_to_ptr.hbm [resolvable:$true] %s1071_s7 }
 0x166   : > { %s1073_s11 = scalar_lea.hbm %s1072_s7, 64  ;;  %p1078_p0 = scmp.lt.s32.totalorder %s1072_s7, %s1465_s5 }
 0x167   : > { %p1074_p10 = scmp.ne.s32.totalorder %s1072_s7, %s1073_s11  ;;  %p1079_p3 = scmp.lt.s32.totalorder %s1077_s21, %s1073_s11 }
 0x169   : > { %p1075_p12 = pnand %p1074_p10, %p1275_p7  ;;  %p1080_p5 = por %p1079_p3, %p1078_p0 }
 0x16b   : > { %p1076_p13 = pneg %p1075_p12 }
 0x16d   : > { %p1081_p9 = pnand %p1080_p5, %p1076_p13 }
 0x16f   : > { %1084 = shalt.err (!%p1081_p9)
}
 0x170   : > { %817 = dma.vmem_to_hbm [thread:$0]  (%p1275_p7), %s559_s17, 1024, %s561_s14, %s1377_s28, %s1162_s13, %s1162_s13, %s1163_s1  }
 0x171 PF: > { %s575_s16 = sand.u32 1, %s1127_s18   ;;  %p833_p2 = pnand %p741_p11, %p1241_p6 }
 0x172   : > { %s576_s12 = scalar_lea.sflag [#allocation4], %s575_s16 }
 0x173   : > { %p834_p1 = pneg %p833_p2 }
 0x175   : > { %1118 = dma.done.wait (%p834_p1), %s576_s12, 1024  }
 0x176   : > { %1120 = vsyncadd (%p834_p1), %s576_s12, 4294966272  ;;  %s1478_s9 = sadd.s32 4294967294, %s1147_s23  }
 0x177   : > { %s585_s29 = sand.u32 1, %s1478_s9  }
 0x178   : > { %s586_s2 = scalar_lea.sflag [#allocation10], %s585_s29 }
 0x179   : > { %1122 = dma.done.wait (%p834_p1), %s586_s2, 2048  }
 0x17a   : > { %1124 = vsyncadd (%p834_p1), %s586_s2, 4294965248  ;;  %s26_s23 = sadd.s32 1, %s1147_s23   ;;  %s1479_s27 = sld [smem:[#allocation16_spill]] }
 0x17b   : > { %p23_p7 = scmp.ge.s32.totalorder %s26_s23, 4   ;;  %s1480_s18 = smov %s1131_s19 }
 0x17c   : > { %s1481_s19 = smov %s1135_s20  ;;  %s1482_s20 = smov %s1284_s10 }
 0x17d   : > { %s1483_s21 = smov %s1143_s22  ;;  %25 = sbr.rel (!%p23_p7) target bundleno = 12 (0xc), region = 126 }
 0x180   : > { %s1484_s22 = smov %s1479_s27 }
 0x182   :  { %602 = vsyncpa [#allocation3], 1 }
 0x183   :  { %604 = vsyncpa [#allocation3 + $0x1], 1 }
 0x184   :  { %605 = vsyncpa [#allocation6], 1 }
 0x185   :  { %606 = vsyncpa [#allocation4], 1 }
 0x186   :  { %608 = vsyncpa [#allocation4 + $0x1], 1 }
 0x187   :  { %609 = vsyncpa [#allocation10], 1 }
 0x188   :  { %611 = vsyncpa [#allocation10 + $0x1], 1 }

// kernel: tpu_custom_call.1
= control target key start
LH: loop header
LB: loop body
LE: loop exit
PB: predicated region body
PF: predicated region fallthrough
CT: control target
= control target key end

     0   :  { %s1460_s0 = inlined_call_operand.hbm [shape: f32[2,16,64], index: 0, kind: input, shape index: {}]   ;;  %s1461_s1 = inlined_call_operand.hbm [shape: f32[64,192], index: 1, kind: input, shape index: {}]   ;;  %s1462_s2 = inlined_call_operand.hbm [shape: f32[1,192], index: 2, kind: input, shape index: {}]   ;;  %s1463_s3 = inlined_call_operand.hbm [shape: f32[2,4,16,16], index: 3, kind: output, shape index: {0}]   ;;  %s1464_s4 = inlined_call_operand.hbm [shape: f32[2,4,16,16], index: 4, kind: output, shape index: {1}]   ;;  %s1465_s5 = inlined_call_operand.hbm [shape: f32[2,4,16,16], index: 5, kind: output, shape index: {2}]  }
   0x1   :  { %1468 = sst [smem:[#allocation17_spill]] %s1461_s1 }
   0x2   :  { %1469 = sst [smem:[#allocation18_spill]] %s1462_s2 }
   0x3   :  { %11 = vsyncpa [#allocation3], 0 }
   0x4   :  { %13 = vsyncpa [#allocation3 + $0x1], 0 }
   0x5   :  { %14 = vsyncpa [#allocation6], 0 }
   0x6   :  { %15 = vsyncpa [#allocation4], 0 }
   0x7   :  { %17 = vsyncpa [#allocation4 + $0x1], 0 }
   0x8   :  { %18 = vsyncpa [#allocation10], 0 }
   0x9   :  { %20 = vsyncpa [#allocation10 + $0x1], 0  ;;  %s1194_s18 = smov 0   ;;  %s1196_s19 = smov 0  }
   0xa   :  { %s1198_s20 = smov 0   ;;  %s1200_s21 = smov 0  }
   0xb   :  { %s1202_s22 = smov 0   ;;  %s1204_s23 = smov 0  }
   0xc LB: > { %s1225_s24 = sadd.s32 4294967295, %s1147_s23   ;;  %s1466_s25 = sadd.s32 4294967294, %s1147_s23   ;;  %s1147_s23 = sphi %s1204_s23, %s26_s23   ;;  %s1143_s22 = sphi %s1202_s22, %s1484_s22   ;;  %s1139_s21 = sphi %s1200_s21, %s1483_s21   ;;  %s1135_s20 = sphi %s1198_s20, %s1482_s20   ;;  %s1131_s19 = sphi %s1196_s19, %s1481_s19   ;;  %s1127_s18 = sphi %s1194_s18, %s1480_s18  }
   0xd   : > { %p60_p0 = scmp.ne.s32.totalorder %s1131_s19, %s1127_s18  ;;  %p61_p1 = scmp.eq.s32.totalorder %s1225_s24, 0 }
   0xe   : > { %p128_p2 = scmp.eq.s32.totalorder %s1225_s24, 1  ;;  %p134_p3 = scmp.eq.s32.totalorder %s1466_s25, 1 }
   0xf   : > { %p1236_p4 = por %p61_p1, %p60_p0  ;;  %p738_p5 = scmp.ge.s32.totalorder %s1147_s23, 1 }
  0x10   : > { %p1241_p6 = por %p134_p3, %p60_p0  ;;  %p197_p7 = scmp.lt.s32.totalorder %s1147_s23, 3 }
  0x11   : > { %s1472_s1 = sld [smem:[#allocation17_spill]]  ;;  %s1149_s7 = smov [#allocation5]  }
  0x12   : > { %p1249_p8 = pnand %p738_p5, %p197_p7  ;;  %s210_s8 = sshll.u32 %s1149_s7, 4  ;;  %s211_s8 = int_to_ptr.vmem [resolvable:$true] %s210_s8 }
  0x13   : > { %p741_p11 = scmp.ge.s32.totalorder %s1147_s23, 2  ;;  %s1474_s2 = sld [smem:[#allocation18_spill]] }
  0x14   : > { %p821_p9 = pneg %p1249_p8  ;;  %s1150_s12 = smov 256  }
  0x15   : > { %s1151_s13 = smov 16   ;;  %s1152_s14 = smov [#allocation7]  }
  0x16   : > { %p822_p10 = pnand %p821_p9, %p61_p1  ;;  %s225_s15 = sshll.u32 %s1152_s14, 4  ;;  %s226_s15 = int_to_ptr.vmem [resolvable:$true] %s225_s15 }
  0x17   : > { %s208_s30 = sshll.u32 %s1472_s1, 4  ;;  %s35_s16 = sadd.s32 1, %s1143_s22  ;;  %s209_s30 = int_to_ptr.hbm [resolvable:$true] %s208_s30 }
  0x18   : > { %824 = dma.hbm_to_vmem [thread:$0]  (!%p822_p10), %s209_s30, 2048, %s211_s8, [#allocation6], %s1150_s12, %s1150_s12, %s1151_s13  }
  0x19   : > { %s223_s11 = sshll.u32 %s1474_s2, 4  ;;  %s47_s17 = sadd.s32 1, %s1135_s20  ;;  %s224_s11 = int_to_ptr.hbm [resolvable:$true] %s223_s11 }
  0x1a   : > { %827 = dma.hbm_to_vmem [thread:$0]  (!%p822_p10), %s224_s11, 32, %s226_s15, [#allocation6]  }
  0x1b   : > { %p36_p12 = scmp.ge.s32.totalorder %s35_s16, 2  ;;  %p54_p13 = scmp.ne.s32.totalorder %s1135_s20, %s1131_s19 }
  0x1c   : > { %p55_p0 = scmp.eq.s32.totalorder %s1147_s23, 0  ;;  %p844_p3 = scmp.lt.s32.totalorder %s1147_s23, 2 }
  0x1d   : > { %s1486_s16 = smov (%p36_p12, %s35_s16), 0  ;;  %p1275_p7 = por %p128_p2, %p54_p13 }
  0x1e   : > { %1475 = sst [smem:[#allocation16_spill]] %s1486_s16  ;;  %p1269_p5 = por %p55_p0, %p54_p13 }
  0x1f   : > { %s42_s30 = ssub.s32 %s1143_s22, %s1486_s16  ;;  %s236_s7 = sand.u32 1, %s1135_s20  }
  0x20   : > { %p45_p9 = scmp.eq.s32.totalorder %s42_s30, 0  ;;  %s742_s8 = sshll.u32 %s236_s7, 4 }
  0x21   : > { %s785_s9 = sshll.u32 %s1143_s22, 4  ;;  %s240_s15 = scalar_lea.vmem [#allocation2], %s742_s8 }
  0x22   : > { %s1284_s10 = scalar_select %p45_p9, %s1135_s20, %s47_s17  }
  0x23   : > { %s247_s13 = scalar_lea.hbm %s1460_s0, %s785_s9  ;;  %s250_s25 = sshll.u32 %s240_s15, 4  ;;  %s251_s25 = int_to_ptr.vmem [resolvable:$true] %s250_s25 }
  0x24   : > { %s248_s14 = sshll.u32 %s247_s13, 4  ;;  %p829_p2 = pnand %p844_p3, %p1269_p5  ;;  %s249_s14 = int_to_ptr.hbm [resolvable:$true] %s248_s14 }
  0x25   : > { %s237_s1 = scalar_lea.sflag [#allocation3], %s236_s7  ;;  %s1153_s2 = smov 128  }
  0x26   : > { %s1154_s16 = smov 8   ;;  %262 = sbr.rel (%p1249_p8) target bundleno = 369 (0x171), region = 32 }
  0x27   : > { %831 = dma.hbm_to_vmem [thread:$0]  (!%p829_p2), %s249_s14, 256, %s251_s25, %s237_s1, %s1153_s2, %s1153_s2, %s1154_s16  }
  0x28   : > { %s1296_s17 = sand.u32 (!%p1249_p8), 1, %s1131_s19  }
  0x29   : > { %s746_s30 = sshll.u32 (!%p1249_p8), %s1296_s17, 4  ;;  %s265_s8 = scalar_lea.sflag (!%p1249_p8), [#allocation3], %s1296_s17 }
  0x2a   : > { %s1300_s9 = scalar_lea.vmem (!%p1249_p8), [#allocation2], %s746_s30 }
  0x2b   : > { %1110 = dma.done.wait (%p1236_p4), %s265_s8, 256  }
  0x2c   : > { %1112 = vsyncadd (%p1236_p4), %s265_s8, 4294967040 }
  0x2d   : > { %1114 = dma.done.wait (%p61_p1), [#allocation6], 2080  }
  0x2e   : > { %1116 = vsyncadd (%p61_p1), [#allocation6], 4294965216  ;;  %v336_v0 = vld [vmem:[#allocation5 + $0x70] sm:$0xff]  ;;  %v334_v1 = vld [vmem:[#allocation5 + $0x60] sm:$0xff]  ;;  %vm344_vm0 = vcmask 523264   ;;  %s1313_s1 = sshll.u32 %s1296_s17, 6 }
  0x2f   : > { %359 = vmatpush.msra.mxu0 %v336_v0  ;;  %v337_v2 = vld [vmem:[#allocation5 + $0x78] sm:$0xff]  ;;  %789 = vmatpush.msra.mxu2 %v336_v0  ;;  %v332_v3 = vld [vmem:[#allocation5 + $0x50] sm:$0xff]  ;;  %v335_v4 = vld [vmem:[#allocation5 + $0x68] sm:$0xff]  ;;  %vm397_vm1 = vcmask 130048   ;;  %s1155_s2 = smov 48   ;;  %s1156_s25 = smov 112  }
  0x30   : > { %382 = vmatpush.msra.mxu1 %v337_v2  ;;  %797 = vmatpush.msra.mxu3 %v337_v2  ;;  %v333_v5 = vld [vmem:[#allocation5 + $0x58] sm:$0xff]  ;;  %v330_v6 = vld [vmem:[#allocation5 + $0x40] sm:$0xff]  ;;  %v331_v7 = vld [vmem:[#allocation5 + $0x48] sm:$0xff]  ;;  %s1316_s26 = scalar_lea.vmem [#allocation8], %s1313_s1  ;;  %s1157_s6 = smov 64  }
  0x31   : > { %360 = vmatpush.msra.mxu0 %v334_v1  ;;  %790 = vmatpush.msra.mxu2 %v334_v1  ;;  %v328_v8 = vld [vmem:[#allocation5 + $0x30] sm:$0xff]  ;;  %v329_v9 = vld [vmem:[#allocation5 + $0x38] sm:$0xff]  ;;  %v326_v10 = vld [vmem:[#allocation5 + $0x20] sm:$0xff]  ;;  %s1321_s16 = scalar_lea.vmem [#allocation11], %s1313_s1  ;;  %s1158_s28 = smov 96  }
  0x32   : > { %383 = vmatpush.msra.mxu1 %v335_v4  ;;  %798 = vmatpush.msra.mxu3 %v335_v4  ;;  %v327_v11 = vld [vmem:[#allocation5 + $0x28] sm:$0xff]  ;;  %v324_v12 = vld [vmem:[#allocation5 + $0x10] sm:$0xff]  ;;  %v325_v13 = vld [vmem:[#allocation5 + $0x18] sm:$0xff]  ;;  %s1159_s7 = smov 32   ;;  %s1160_s11 = smov 80  }
  0x33   : > { %361 = vmatpush.msra.mxu0 %v332_v3  ;;  %791 = vmatpush.msra.mxu2 %v332_v3  ;;  %v322_v14 = vld [vmem:[#allocation5] sm:$0xff]  ;;  %v323_v16 = vld [vmem:[#allocation5 + $0x8] sm:$0xff]  ;;  %s1161_s12 = smov 16   ;;  %s1330_s13 = scalar_lea.vmem [#allocation9], %s1313_s1 }
  0x34   : > { %384 = vmatpush.msra.mxu1 %v333_v5  ;;  %799 = vmatpush.msra.mxu3 %v333_v5  ;;  %v320_v15 = vld [vmem:[%s1300_s9] sm:$0xff]  ;;  %v321_v17 = vld [vmem:[%s1300_s9 + $0x8] sm:$0xff]  ;;  %s1357_s14 = sshll.u32 %s1139_s21, 6  ;;  %s539_s9 = sshll.u32 %s1330_s13, 4  ;;  %s540_s9 = int_to_ptr.vmem [resolvable:$true] %s539_s9 }
  0x35   : > { %362 = vmatpush.msra.mxu0 %v330_v6  ;;  %792 = vmatpush.msra.mxu2 %v330_v6  ;;  %v338_v18 = vld [vmem:[#allocation7] sm:$0x3]  ;;  %s538_s8 = scalar_lea.hbm %s1464_s4, %s1357_s14  ;;  %s500_s1 = sand.u32 1, %s1225_s24  }
  0x36   : > { %385 = vmatpush.msra.mxu1 %v331_v7  ;;  %800 = vmatpush.msra.mxu3 %v331_v7  ;;  %v340_v19 = vperm.slane %v338_v18, 0  ;;  %v341_v20 = vperm.slane %v338_v18, 1  ;;  %s1021_s15 = scalar_lea.hbm %s1464_s4, 128 }
  0x37   : > { %363 = vmatpush.msra.mxu0 %v328_v8  ;;  %793 = vmatpush.msra.mxu2 %v328_v8 }
  0x38   : > { %386 = vmatpush.msra.mxu1 %v329_v9  ;;  %801 = vmatpush.msra.mxu3 %v329_v9 }
  0x39   : > { %364 = vmatpush.msra.mxu0 %v326_v10  ;;  %794 = vmatpush.msra.mxu2 %v326_v10 }
  0x3a   : > { %387 = vmatpush.msra.mxu1 %v327_v11  ;;  %802 = vmatpush.msra.mxu3 %v327_v11 }
  0x3b   : > { %365 = vmatpush.msra.mxu0 %v324_v12  ;;  %795 = vmatpush.msra.mxu2 %v324_v12 }
  0x3c   : > { %388 = vmatpush.msra.mxu1 %v325_v13  ;;  %803 = vmatpush.msra.mxu3 %v325_v13 }
  0x3d   : > { %366 = vmatpush.msra.mxu0 %v322_v14  ;;  %796 = vmatpush.msra.mxu2 %v322_v14 }
  0x3e   : > { %752 = vmatmul.msk.f32.vlgmr.msra.gmra.mxu0 %vm344_vm0, %v320_v15  ;;  %389 = vmatpush.msra.mxu1 %v323_v16 }
  0x3f   : > { %754 = vmatmul.msk.f32.vlgmr.msra.gmra.mxu1 %vm344_vm0, %v320_v15  ;;  %753 = vmatmul.msk.f32.vlgmr.msra.gmra.mxu2 %vm344_vm0, %v321_v17 }
  0x40   : > { %804 = vmatpush.msra.mxu3 %v323_v16 }
  0x41   : > { %755 = vmatmul.msk.f32.vlgmr.msra.gmra.mxu3 %vm344_vm0, %v321_v17 }
  0xbb   : > { %v368_v21 = vpop.f32.mrf.mxu0 }
  0xbc   : > { %v369_v22 = vadd.f32 %v368_v21, %v340_v19  ;;  %v391_v23 = vpop.f32.mrf.mxu1 }
  0xbd   : > { %v392_v24 = vadd.f32 %v391_v23, %v341_v20 }
  0xbe   : > { %421 = vrot.lane.b32.xlu2 %v369_v22, %s1155_s2  ;;  %412 = vrot.lane.b32.xlu1 %v369_v22, %s1156_s25  ;;  %398 = vst.msk [vmem:[%s1316_s26] sm:$0xff] %vm397_vm1, %v369_v22 }
  0xbf   : > { %402 = vrot.lane.b32.xlu0 %v369_v22, %s1157_s6  ;;  %410 = vst.msk [vmem:[%s1321_s16] sm:$0xff] %vm397_vm1, %v392_v24 }
  0xc2   : > { %v371_v25 = vpop.f32.mrf.mxu2 }
  0xc3   : > { %v372_v26 = vadd.f32 %v371_v25, %v340_v19 }
  0xc4   : > { %v394_v27 = vpop.f32.mrf.mxu3 }
  0xc5   : > { %v395_v28 = vadd.f32 %v394_v27, %v341_v20  ;;  %399 = vst.msk [vmem:[%s1316_s26 + $0x8] sm:$0xff] %vm397_vm1, %v372_v26 }
  0xc6   : > { %459 = vrot.lane.b32.xlu2 %v392_v24, %s1158_s28  ;;  %450 = vrot.lane.b32.xlu1 %v369_v22, %s1159_s7 }
  0xc7   : > { %432 = vrot.lane.b32.xlu0 %v392_v24, %s1156_s25  ;;  %411 = vst.msk [vmem:[%s1321_s16 + $0x8] sm:$0xff] %vm397_vm1, %v395_v28 }
  0xce   : > { %423 = vrot.lane.b32.xlu2 %v372_v26, %s1155_s2  ;;  %468 = vrot.lane.b32.xlu1 %v369_v22, %s1160_s11  ;;  %s541_s2 = sshll.u32 %s538_s8, 4  ;;  %s542_s2 = int_to_ptr.hbm [resolvable:$true] %s541_s2 }
  0xcf   : > { %477 = vrot.lane.b32.xlu0 %v369_v22, %s1161_s12 }
  0xd6   : > { %452 = vrot.lane.b32.xlu2 %v372_v26, %s1159_s7  ;;  %414 = vrot.lane.b32.xlu1 %v372_v26, %s1156_s25  ;;  %s1015_s7 = sshra.s32 %s542_s2, 4  ;;  %s1016_s7 = int_to_ptr.hbm [resolvable:$true] %s1015_s7 }
  0xd7   : > { %441 = vrot.lane.b32.xlu0 %v369_v22, %s1158_s28  ;;  %p1022_p10 = scmp.lt.s32.totalorder %s1016_s7, %s1464_s4 }
  0xde   : > { %434 = vrot.lane.b32.xlu2 %v395_v28, %s1156_s25  ;;  %479 = vrot.lane.b32.xlu1 %v372_v26, %s1161_s12 }
  0xdf   : > { %404 = vrot.lane.b32.xlu0 %v372_v26, %s1157_s6  ;;  %s519_s6 = scalar_lea.hbm %s1463_s3, %s1357_s14 }
  0xe6   : > { %470 = vrot.lane.b32.xlu2 %v372_v26, %s1160_s11  ;;  %443 = vrot.lane.b32.xlu1 %v372_v26, %s1158_s28 }
  0xe7   : > { %461 = vrot.lane.b32.xlu0 %v395_v28, %s1158_s28  ;;  %s1377_s28 = scalar_lea.sflag [#allocation10], %s500_s1 }
  0xee   : > { %488 = vrot.lane.b32.xlu1 %v395_v28, %s1160_s11 }
  0xef   : > { %486 = vrot.lane.b32.xlu0 %v392_v24, %s1160_s11  ;;  %s1017_s11 = scalar_lea.hbm %s1016_s7, 64 }
  0xf0   : > { %p1018_p1 = scmp.ne.s32.totalorder %s1016_s7, %s1017_s11  ;;  %p1023_p12 = scmp.lt.s32.totalorder %s1021_s15, %s1017_s11 }
  0xf2   : > { %p1019_p4 = pnand %p1018_p1, %p1275_p7  ;;  %p1024_p13 = por %p1023_p12, %p1022_p10 }
  0xf4   : > { %p1020_p8 = pneg %p1019_p4 }
  0xf6   : > { %p1025_p0 = pnand %p1024_p13, %p1020_p8 }
 0x118   : > { %v422_v29 = vpop.permute.xlu2 %421 }
 0x119   : > { %758 = vst.msk [vmem:[%s1330_s13 + $0x10] sm:$0xff] %vm397_vm1, %v422_v29 }
 0x120   : > { %v460_v30 = vpop.permute.xlu2 %459 }
 0x121   : > { %766 = vst.msk [vmem:[%s1321_s16 + $0x20] sm:$0xff] %vm397_vm1, %v460_v30 }
 0x128   : > { %v424_v31 = vpop.permute.xlu2 %423 }
 0x129   : > { %759 = vst.msk [vmem:[%s1330_s13 + $0x18] sm:$0xff] %vm397_vm1, %v424_v31 }
 0x130   : > { %v453_v32 = vpop.permute.xlu2 %452  ;;  %v413_v33 = vpop.permute.xlu1 %412 }
 0x131   : > { %765 = vst.msk [vmem:[%s1330_s13 + $0x28] sm:$0xff] %vm397_vm1, %v453_v32  ;;  %v403_v34 = vpop.permute.xlu0 %402 }
 0x132   : > { %756 = vst.msk [vmem:[%s1316_s26 + $0x10] sm:$0xff] %vm397_vm1, %v413_v33 }
 0x133   : > { %408 = vst.msk [vmem:[%s1330_s13] sm:$0xff] %vm397_vm1, %v403_v34 }
 0x138   : > { %v435_v35 = vpop.permute.xlu2 %434  ;;  %v451_v36 = vpop.permute.xlu1 %450 }
 0x139   : > { %761 = vst.msk [vmem:[%s1321_s16 + $0x18] sm:$0xff] %vm397_vm1, %v435_v35  ;;  %v433_v37 = vpop.permute.xlu0 %432 }
 0x13a   : > { %764 = vst.msk [vmem:[%s1330_s13 + $0x20] sm:$0xff] %vm397_vm1, %v451_v36 }
 0x13b   : > { %760 = vst.msk [vmem:[%s1321_s16 + $0x10] sm:$0xff] %vm397_vm1, %v433_v37 }
 0x140   : > { %v471_v38 = vpop.permute.xlu2 %470  ;;  %v469_v39 = vpop.permute.xlu1 %468 }
 0x141   : > { %769 = vst.msk [vmem:[%s1316_s26 + $0x38] sm:$0xff] %vm397_vm1, %v471_v38  ;;  %v478_v40 = vpop.permute.xlu0 %477 }
 0x142   : > { %768 = vst.msk [vmem:[%s1316_s26 + $0x30] sm:$0xff] %vm397_vm1, %v469_v39 }
 0x143   : > { %770 = vst.msk [vmem:[%s1330_s13 + $0x30] sm:$0xff] %vm397_vm1, %v478_v40 }
 0x148   : > { %v415_v41 = vpop.permute.xlu1 %414 }
 0x149   : > { %757 = vst.msk [vmem:[%s1316_s26 + $0x18] sm:$0xff] %vm397_vm1, %v415_v41  ;;  %v442_v42 = vpop.permute.xlu0 %441 }
 0x14a   : > { %762 = vst.msk [vmem:[%s1316_s26 + $0x20] sm:$0xff] %vm397_vm1, %v442_v42 }
 0x150   : > { %v480_v43 = vpop.permute.xlu1 %479 }
 0x151   : > { %771 = vst.msk [vmem:[%s1330_s13 + $0x38] sm:$0xff] %vm397_vm1, %v480_v43  ;;  %v405_v44 = vpop.permute.xlu0 %404 }
 0x152   : > { %409 = vst.msk [vmem:[%s1330_s13 + $0x8] sm:$0xff] %vm397_vm1, %v405_v44 }
 0x153   : > { %1028 = shalt.err (!%p1025_p0)
}
 0x154   : > { %s1162_s13 = smov 128   ;;  %s1163_s1 = smov 8  }
 0x155   : > { %816 = dma.vmem_to_hbm [thread:$0]  (%p1275_p7), %s540_s9, 1024, %s542_s2, %s1377_s28, %s1162_s13, %s1162_s13, %s1163_s1  }
 0x156   : > { %s520_s21 = sshll.u32 %s1316_s26, 4  ;;  %s522_s25 = sshll.u32 %s519_s6, 4  ;;  %s521_s21 = int_to_ptr.vmem [resolvable:$true] %s520_s21  ;;  %s523_s25 = int_to_ptr.hbm [resolvable:$true] %s522_s25 }
 0x157   : > { %s557_s24 = scalar_lea.hbm %s1465_s5, %s1357_s14  ;;  %s496_s12 = scalar_lea.sflag [#allocation4], %s1296_s17 }
 0x158   : > { %v444_v45 = vpop.permute.xlu1 %443  ;;  %s1043_s15 = sshra.s32 %s523_s25, 4  ;;  %s1049_s6 = scalar_lea.hbm %s1463_s3, 128  ;;  %s1044_s15 = int_to_ptr.hbm [resolvable:$true] %s1043_s15 }
 0x159   : > { %763 = vst.msk [vmem:[%s1316_s26 + $0x28] sm:$0xff] %vm397_vm1, %v444_v45  ;;  %v462_v46 = vpop.permute.xlu0 %461  ;;  %s1045_s30 = scalar_lea.hbm %s1044_s15, 64  ;;  %p1050_p2 = scmp.lt.s32.totalorder %s1044_s15, %s1463_s3 }
 0x15a   : > { %767 = vst.msk [vmem:[%s1321_s16 + $0x28] sm:$0xff] %vm397_vm1, %v462_v46  ;;  %p1046_p3 = scmp.ne.s32.totalorder %s1044_s15, %s1045_s30  ;;  %p1051_p1 = scmp.lt.s32.totalorder %s1049_s6, %s1045_s30 }
 0x15c   : > { %p1047_p5 = pnand %p1046_p3, %p1275_p7  ;;  %p1052_p4 = por %p1051_p1, %p1050_p2 }
 0x15e   : > { %p1048_p9 = pneg %p1047_p5 }
 0x160   : > { %p1053_p8 = pnand %p1052_p4, %p1048_p9 }
 0x162   : > { %1056 = shalt.err (!%p1053_p8)
}
 0x163   : > { %815 = dma.vmem_to_hbm [thread:$0]  (%p1275_p7), %s521_s21, 1024, %s523_s25, %s496_s12, %s1162_s13, %s1162_s13, %s1163_s1   ;;  %v489_v47 = vpop.permute.xlu1 %488  ;;  %v487_v48 = vpop.permute.xlu0 %486 }
 0x164   : > { %s558_s17 = sshll.u32 %s1321_s16, 4  ;;  %s560_s14 = sshll.u32 %s557_s24, 4  ;;  %773 = vst.msk [vmem:[%s1321_s16 + $0x38] sm:$0xff] %vm397_vm1, %v489_v47  ;;  %s559_s17 = int_to_ptr.vmem [resolvable:$true] %s558_s17  ;;  %s561_s14 = int_to_ptr.hbm [resolvable:$true] %s560_s14 }
 0x165   : > { %772 = vst.msk [vmem:[%s1321_s16 + $0x30] sm:$0xff] %vm397_vm1, %v487_v48  ;;  %s1071_s7 = sshra.s32 %s561_s14, 4  ;;  %s1077_s21 = scalar_lea.hbm %s1465_s5, 128  ;;  %s1072_s7 = int_to_ptr.hbm [resolvable:$true] %s1071_s7 }
 0x166   : > { %s1073_s11 = scalar_lea.hbm %s1072_s7, 64  ;;  %p1078_p0 = scmp.lt.s32.totalorder %s1072_s7, %s1465_s5 }
 0x167   : > { %p1074_p10 = scmp.ne.s32.totalorder %s1072_s7, %s1073_s11  ;;  %p1079_p3 = scmp.lt.s32.totalorder %s1077_s21, %s1073_s11 }
 0x169   : > { %p1075_p12 = pnand %p1074_p10, %p1275_p7  ;;  %p1080_p5 = por %p1079_p3, %p1078_p0 }
 0x16b   : > { %p1076_p13 = pneg %p1075_p12 }
 0x16d   : > { %p1081_p9 = pnand %p1080_p5, %p1076_p13 }
 0x16f   : > { %1084 = shalt.err (!%p1081_p9)
}
 0x170   : > { %817 = dma.vmem_to_hbm [thread:$0]  (%p1275_p7), %s559_s17, 1024, %s561_s14, %s1377_s28, %s1162_s13, %s1162_s13, %s1163_s1  }
 0x171 PF: > { %s575_s16 = sand.u32 1, %s1127_s18   ;;  %p833_p2 = pnand %p741_p11, %p1241_p6 }
 0x172   : > { %s576_s12 = scalar_lea.sflag [#allocation4], %s575_s16 }
 0x173   : > { %p834_p1 = pneg %p833_p2 }
 0x175   : > { %1118 = dma.done.wait (%p834_p1), %s576_s12, 1024  }
 0x176   : > { %1120 = vsyncadd (%p834_p1), %s576_s12, 4294966272  ;;  %s1478_s9 = sadd.s32 4294967294, %s1147_s23  }
 0x177   : > { %s585_s29 = sand.u32 1, %s1478_s9  }
 0x178   : > { %s586_s2 = scalar_lea.sflag [#allocation10], %s585_s29 }
 0x179   : > { %1122 = dma.done.wait (%p834_p1), %s586_s2, 2048  }
 0x17a   : > { %1124 = vsyncadd (%p834_p1), %s586_s2, 4294965248  ;;  %s26_s23 = sadd.s32 1, %s1147_s23   ;;  %s1479_s27 = sld [smem:[#allocation16_spill]] }
 0x17b   : > { %p23_p7 = scmp.ge.s32.totalorder %s26_s23, 4   ;;  %s1480_s18 = smov %s1131_s19 }
 0x17c   : > { %s1481_s19 = smov %s1135_s20  ;;  %s1482_s20 = smov %s1284_s10 }
 0x17d   : > { %s1483_s21 = smov %s1143_s22  ;;  %25 = sbr.rel (!%p23_p7) target bundleno = 12 (0xc), region = 126 }
 0x180   : > { %s1484_s22 = smov %s1479_s27 }
 0x182   :  { %602 = vsyncpa [#allocation3], 1 }
 0x183   :  { %604 = vsyncpa [#allocation3 + $0x1], 1 }
 0x184   :  { %605 = vsyncpa [#allocation6], 1 }
 0x185   :  { %606 = vsyncpa [#allocation4], 1 }
 0x186   :  { %608 = vsyncpa [#allocation4 + $0x1], 1 }
 0x187   :  { %609 = vsyncpa [#allocation10], 1 }
 0x188   :  { %611 = vsyncpa [#allocation10 + $0x1], 1 }

</bundles_post_ra>
